<compile_context>
chip_gen: v5e
topology: v5e:2x2
jax: 0.10.0
libtpu: 0.0.40
codegen_flags: <defaults>
</compile_context>

<pallas_src>
import functools

import jax
import jax.numpy as jnp
from jax.experimental import pallas as pl
from jax.experimental.pallas import tpu as pltpu

LANE = 128     # output channels are zero-padded to a multiple of this (lane width)
SUB = 16       # bf16 sublane packing: padded lengths kept multiples of this


def _ceil_to(x, m):
    return -(-x // m) * m


def _drug_backbone_kernel(x_ref, *refs, metas, Bt):
    """Fused Conv1d+ReLU+MaxPool1d stack; all intermediates stay in VMEM/vregs."""
    o_ref = refs[-1]
    x = x_ref[...]                                       # (Bt, Lp0, C0) bf16
    n_layers = len(metas)
    for li, (use_im2col, K, pool, Lc, n_out, C_pad) in enumerate(metas):
        w_ref = refs[2 * li]                             # packed bf16 weights
        b_ref = refs[2 * li + 1]                         # (1, C_pad) f32 bias
        C_in = x.shape[-1]
        Lp = x.shape[1]
        if use_im2col:
            # Narrow C_in (first layer): fold the K taps into the contraction so
            # the conv is ONE deep matmul.  Lc % 16 == 0 -> layout-preserving
            # row collapse.
            patches = jnp.concatenate(
                [x[:, k:k + Lc, :] for k in range(K)], axis=-1)      # (Bt, Lc, K*C_in)
            acc = jnp.dot(patches.reshape(Bt * Lc, K * C_in), w_ref[...],
                          preferred_element_type=jnp.float32)
            acc = acc.reshape(Bt, Lc, C_pad)
        else:
            # Lane-wide C_in: one wide matmul over the full padded length
            # (Lp % 16 == 0 -> free collapse), then shift-and-add the K
            # lane-tile-aligned per-tap blocks.  No im2col concat, no unaligned
            # reshape, contraction depth = C_in (>= 128).
            prod = jnp.dot(x.reshape(Bt * Lp, C_in), w_ref[...],
                           preferred_element_type=jnp.float32)       # (Bt*Lp, K*C_pad)
            prod = prod.reshape(Bt, Lp, K * C_pad)
            acc = prod[:, 0:Lc, 0:C_pad]
            for k in range(1, K):
                acc = acc + prod[:, k:k + Lc, k * C_pad:(k + 1) * C_pad]
        bias = b_ref[...].reshape(1, 1, C_pad)
        y = jnp.maximum(acc + bias, 0.0)                 # bias + ReLU in f32
        # MaxPool1d(pool): fold pool groups into the lane axis, then elementwise
        # maxima of 128-lane-aligned tiles (no sub-8 sublane reduce through XLU).
        Lk = n_out * pool
        y = y[:, :Lk, :].reshape(Bt, n_out, pool * C_pad)
        pooled = y[:, :, 0:C_pad]
        for pi in range(1, pool):
            pooled = jnp.maximum(pooled, y[:, :, pi * C_pad:(pi + 1) * C_pad])
        if li + 1 < n_layers:
            x = pooled.astype(jnp.bfloat16)              # bf16 operand for next matmul
        else:
            o_ref[...] = pooled.astype(o_ref.dtype)      # lane-dense full-tile store


def _pick_bt(B):
    """Batch-block size: generation-aware grid sizing."""
    try:
        kind = jax.devices()[0].device_kind.lower()
    except Exception:
        kind = ""
    dual_tc = ("v7" in kind) or ("7x" in kind)
    if B <= 4:
        # Tiny batch: on single-TC chips a split only adds per-step overhead and
        # halves MXU M -> grid=1.  On v7x give each TensorCore one block.
        if dual_tc and B >= 2:
            return -(-B // 2)
        return B
    # Larger batches: target >= 4 grid steps so the input DMA hides behind
    # compute in the software pipeline, while keeping M = Bt*L_conv large.
    return max(1, min(8, -(-B // 4)))


def _vmem_bytes(Bt, Lp0, C0, metas, weight_bytes, L_final, C_final):
    """Rough per-block VMEM budget (used for Bt clamping and vmem_limit_bytes)."""
    total = weight_bytes                               # single-buffered weights/bias
    total += 2 * Bt * Lp0 * C0 * 2                     # input block (double-buffered, bf16)
    total += 2 * Bt * L_final * C_final * 4            # output block (double-buffered, f32)
    peak = 0
    Lp, C_in = Lp0, C0
    for (use_im2col, K, pool, Lc, n_out, C_pad) in metas:
        if use_im2col:
            live = Bt * Lc * K * C_in * 2 + Bt * Lc * C_pad * 4
        else:
            live = Bt * Lp * C_in * 2 + Bt * Lp * K * C_pad * 4 + Bt * Lc * C_pad * 4
        live += 2 * Bt * n_out * pool * C_pad * 4      # pool relayout + result
        peak = max(peak, live)
        Lp, C_in = n_out, C_pad
    return total + 2 * peak                            # 2x headroom for compiler temps


def drug_backbone(x_lc, plan):
    """x_lc: (B, Lp0, C0) bf16 channels-last, already length-padded per the plan.

    plan: list of dicts with packed bf16 weights, f32 bias and static layer meta.
    Returns (B, L_final, C_pad_final) float32 (lane-padded channels).
    """
    B, Lp0, C0 = x_lc.shape
    metas = tuple((p['use_im2col'], p['K'], p['pool'], p['Lc'], p['n_out'], p['C_pad'])
                  for p in plan)
    L_final = plan[-1]['n_out']
    C_final = plan[-1]['C_pad']
    weight_bytes = sum(int(p['W'].size) * 2 + int(p['b'].size) * 4 for p in plan)

    Bt = _pick_bt(B)
    budget = 48 << 20   # stay well inside v7x's 64 MiB physical VMEM
    while Bt > 1 and _vmem_bytes(Bt, Lp0, C0, metas, weight_bytes, L_final, C_final) > budget:
        Bt = -(-Bt // 2)
    n_blocks = pl.cdiv(B, Bt)
    B_pad = n_blocks * Bt
    if B_pad != B:
        x_lc = jnp.pad(x_lc, ((0, B_pad - B), (0, 0), (0, 0)))

    vmem_limit = int(min(max(_vmem_bytes(Bt, Lp0, C0, metas, weight_bytes,
                                         L_final, C_final), 32 << 20), 64 << 20))
    kernel = functools.partial(_drug_backbone_kernel, metas=metas, Bt=Bt)
    out_shape = jax.ShapeDtypeStruct((B_pad, L_final, C_final), jnp.float32)

    def run(single_buffer_weights):
        in_specs = [pl.BlockSpec((Bt, Lp0, C0), lambda i: (i, 0, 0))]
        args = [x_lc]
        for p in plan:
            for arr in (p['W'], p['b']):
                if single_buffer_weights:
                    # Grid-invariant operands: single-buffered -> half the VMEM.
                    spec = pl.BlockSpec(arr.shape, lambda i: (0, 0),
                                        pipeline_mode=pl.Buffered(1))
                else:
                    spec = pl.BlockSpec(arr.shape, lambda i: (0, 0))
                in_specs.append(spec)
                args.append(arr)
        return pl.pallas_call(
            kernel,
            out_shape=out_shape,
            grid_spec=pltpu.PrefetchScalarGridSpec(
                num_scalar_prefetch=0,
                grid=(n_blocks,),
                in_specs=in_specs,
                out_specs=pl.BlockSpec((Bt, L_final, C_final), lambda i: (i, 0, 0)),
            ),
            compiler_params=pltpu.CompilerParams(
                dimension_semantics=("parallel",),
                vmem_limit_bytes=vmem_limit),
        )(*args)

    try:
        out = run(True)
    except Exception:
        # Fallback if this Pallas version rejects Buffered(1) single-buffering.
        out = run(False)
    return out[:B]


class DrugPallas:
    """Pallas port of `Drug`: stacked Conv1d -> ReLU -> MaxPool1d, then flatten."""

    def __init__(self, input_drug_feature_dim, input_drug_feature_channel,
                 layer_hyperparameter, layer_num, key):
        assert len(layer_hyperparameter['cnn_channels']) == layer_num, \
            'Number of layer is not same as hyperparameter list.'
        self.input_drug_feature_channel = input_drug_feature_channel
        in_ch = input_drug_feature_channel
        dim = input_drug_feature_dim
        self.layers = []          # raw torch-layout f32 params (used by the reference)
        plan = []                 # kernel-ready packed params + static metadata
        c_in_eff = input_drug_feature_channel
        for idx, out_ch in enumerate(layer_hyperparameter['cnn_channels']):
            ks = layer_hyperparameter['kernel_size'][idx]
            pool = layer_hyperparameter['maxpool1d'][idx]
            key, kw, kb = jax.random.split(key, 3)
            fan_in = in_ch * ks
            bound = 1.0 / (fan_in ** 0.5)        # PyTorch Conv1d default init range
            w = jax.random.uniform(kw, (out_ch, in_ch, ks), jnp.float32, -bound, bound)
            b = jax.random.uniform(kb, (out_ch,), jnp.float32, -bound, bound)
            self.layers.append((w, b, pool))
            c_pad = _ceil_to(out_ch, LANE)
            use_im2col = c_in_eff < LANE
            # Zero-pad C_in to the previous layer's padded width and C_out to a
            # multiple of 128 lanes; padded bias lanes stay 0, so padded channels
            # remain exactly 0 through ReLU / maxpool.
            w_p = jnp.zeros((c_pad, c_in_eff, ks), jnp.float32)
            w_p = w_p.at[:out_ch, :in_ch, :].set(w)
            if use_im2col:
                # W[k*C_in + i, o] = w[o, i, k]  (taps folded into the contraction)
                W = jnp.transpose(w_p, (2, 1, 0)).reshape(ks * c_in_eff, c_pad)
            else:
                # W[i, k*C_pad + o] = w[o, i, k] (taps laid out as lane-tile blocks)
                W = jnp.transpose(w_p, (1, 2, 0)).reshape(c_in_eff, ks * c_pad)
            W = W.astype(jnp.bfloat16)           # bf16 MXU operand, f32 accumulation
            b2 = jnp.zeros((1, c_pad), jnp.float32).at[0, :out_ch].set(b)
            plan.append(dict(W=W, b=b2, K=ks, pool=pool, use_im2col=use_im2col,
                             C_in=c_in_eff, C_pad=c_pad))
            c_in_eff = c_pad
            in_ch = out_ch
            dim = (dim - ks + 1) // pool
        self.drug_output_feature_channel = in_ch
        self.drug_output_feature_dim = dim

        # Backward length planning: choose per-layer padded conv/pool lengths so
        # every in-kernel row-collapse reshape is 16-row aligned (free for bf16)
        # and every tap slice stays in bounds.  Padded rows carry finite garbage
        # that never reaches a kept output (floor-truncating maxpool).
        need = dim                                   # last layer: exact true length
        for p in reversed(plan):
            p['n_out'] = need
            lc = need * p['pool']
            if p['use_im2col']:
                lc = _ceil_to(lc, SUB)
            p['Lc'] = lc
            need_in = lc + p['K'] - 1
            if not p['use_im2col']:
                need_in = _ceil_to(need_in, SUB)     # free collapse of x in the kernel
            need = need_in
        self.input_len_padded = need
        self.plan = plan

    def __call__(self, x_ncl):
        # TODO(synk): the SMILES -> one-hot lookup (torch.load of tCNNs_encode.pth)
        # is a host-side dict lookup with no Pallas equivalent; x_ncl stands in for
        # the stacked tCNNs_drug_matrix batch, shape (B, C, L).
        B, C, L = x_ncl.shape
        if C != self.input_drug_feature_channel:
            pad = jnp.zeros((B, self.input_drug_feature_channel - C, L), x_ncl.dtype)
            x_ncl = jnp.concatenate([pad, x_ncl], axis=1)    # zero channels prepended
        x = jnp.transpose(x_ncl, (0, 2, 1)).astype(jnp.bfloat16)    # (B, L, C)
        # Length pad/trim to the planned padded input length (trailing zeros never
        # reach a kept output thanks to the floor-truncating pools).
        Lp0 = self.input_len_padded
        if Lp0 <= L:
            x = x[:, :Lp0, :]
        else:
            x = jnp.pad(x, ((0, 0), (0, Lp0 - L), (0, 0)))
        # TODO(synk): layer-1 input uses only C0 of 128 lanes; acceptable at these
        # sizes — a lane-dense repack in the wrapper would go here if L grows.
        y = drug_backbone(x, self.plan)                       # (B, L_final, C_pad)
        y = y[:, :, :self.drug_output_feature_channel]        # strip lane padding
        y = jnp.transpose(y, (0, 2, 1))                       # back to (B, C, L)
        return y.reshape(B, -1)                               # == torch x.view(-1, C*L)


def _reference(x_ncl, model):
    """Plain-JAX f32 reference with identical semantics (NCL layout, like PyTorch)."""
    B, C, L = x_ncl.shape
    if C != model.input_drug_feature_channel:
        pad = jnp.zeros((B, model.input_drug_feature_channel - C, L), jnp.float32)
        x_ncl = jnp.concatenate([pad, x_ncl], axis=1)
    x = x_ncl
    for (w, b, pool) in model.layers:
        C_out, C_in, K = w.shape
        L_in = x.shape[2]
        L_conv = L_in - K + 1
        y = jnp.zeros((x.shape[0], C_out, L_conv), jnp.float32)
        for k in range(K):
            y = y + jnp.einsum('oi,bil->bol', w[:, :, k], x[:, :, k:k + L_conv])
        y = jnp.maximum(y + b[None, :, None], 0.0)
        L_pool = L_conv // pool
        y = y[:, :, :L_pool * pool].reshape(x.shape[0], C_out, L_pool, pool).max(-1)
        x = y
    return x.reshape(x.shape[0], -1)


if __name__ == "__main__":
    key = jax.random.PRNGKey(0)
    k_in, k_params = jax.random.split(key)

    # Small shapes: batch=2, raw drug matrix has 4 channels (< 8 -> exercises the
    # zero-channel-padding branch), sequence length 64.
    B, raw_C, L = 2, 4, 64
    layer_hyperparameter = {
        'cnn_channels': [16, 32],
        'kernel_size': [5, 5],
        'maxpool1d': [2, 2],
    }
    model = DrugPallas(input_drug_feature_dim=L, input_drug_feature_channel=8,
                       layer_hyperparameter=layer_hyperparameter, layer_num=2,
                       key=k_params)

    x = jax.random.uniform(k_in, (B, raw_C, L), dtype=jnp.float32)

    out = jax.block_until_ready(model(x))

    expected_shape = (B, model.drug_output_feature_channel * model.drug_output_feature_dim)
    assert out.shape == expected_shape, (out.shape, expected_shape)

    ref = _reference(x, model)
    err = float(jnp.max(jnp.abs(out - ref)))
    # bf16 MXU operands (f32 accumulation) vs the f32 reference -> relaxed tolerance.
    assert jnp.allclose(out, ref, rtol=5e-2, atol=2e-2), err

    print("KERNEL_OK")
</pallas_src>

<mosaic_0001>
module attributes {stable_mosaic.version = 11 : i64} {
  func.func @_drug_backbone_kernel(%arg0: i32, %arg1: memref<2x68x8xbf16, #tpu.memory_space<vmem>>, %arg2: memref<40x128xbf16, #tpu.memory_space<vmem>>, %arg3: memref<1x128xf32, #tpu.memory_space<vmem>>, %arg4: memref<128x640xbf16, #tpu.memory_space<vmem>>, %arg5: memref<1x128xf32, #tpu.memory_space<vmem>>, %arg6: memref<2x13x128xf32, #tpu.memory_space<vmem>>) attributes {dimension_semantics = [#tpu.dimension_semantics<parallel>], iteration_bounds = array<i64: 1>, scalar_prefetch = 0 : i64, scratch_operands = 0 : i64, tpu.core_type = #tpu.core_type<tc>, window_params = [{transform_indices = @transform_0, window_bounds = array<i64: 2, 68, 8>}, {pipeline_mode = #tpu.pipeline_mode<synchronous>, transform_indices = @transform_1, window_bounds = array<i64: 40, 128>}, {pipeline_mode = #tpu.pipeline_mode<synchronous>, transform_indices = @transform_2, window_bounds = array<i64: 1, 128>}, {pipeline_mode = #tpu.pipeline_mode<synchronous>, transform_indices = @transform_3, window_bounds = array<i64: 128, 640>}, {pipeline_mode = #tpu.pipeline_mode<synchronous>, transform_indices = @transform_4, window_bounds = array<i64: 1, 128>}, {transform_indices = @transform_5, window_bounds = array<i64: 2, 13, 128>}]} {
    %c0 = arith.constant 0 : index
    %c0_0 = arith.constant 0 : index
    %c0_1 = arith.constant 0 : index
    %0 = vector.load %arg1[%c0, %c0_0, %c0_1] : memref<2x68x8xbf16, #tpu.memory_space<vmem>>, vector<2x68x8xbf16>
    %1 = vector.extract_strided_slice %0 {offsets = [0, 0, 0], sizes = [2, 64, 8], strides = [1, 1, 1]} : vector<2x68x8xbf16> to vector<2x64x8xbf16>
    %2 = vector.extract_strided_slice %0 {offsets = [0, 1, 0], sizes = [2, 64, 8], strides = [1, 1, 1]} : vector<2x68x8xbf16> to vector<2x64x8xbf16>
    %3 = vector.extract_strided_slice %0 {offsets = [0, 2, 0], sizes = [2, 64, 8], strides = [1, 1, 1]} : vector<2x68x8xbf16> to vector<2x64x8xbf16>
    %4 = vector.extract_strided_slice %0 {offsets = [0, 3, 0], sizes = [2, 64, 8], strides = [1, 1, 1]} : vector<2x68x8xbf16> to vector<2x64x8xbf16>
    %5 = vector.extract_strided_slice %0 {offsets = [0, 4, 0], sizes = [2, 64, 8], strides = [1, 1, 1]} : vector<2x68x8xbf16> to vector<2x64x8xbf16>
    %6 = tpu.concatenate %1, %2, %3, %4, %5 in 2 : vector<2x64x8xbf16>, vector<2x64x8xbf16>, vector<2x64x8xbf16>, vector<2x64x8xbf16>, vector<2x64x8xbf16> -> vector<2x64x40xbf16>
    %7 = vector.shape_cast %6 : vector<2x64x40xbf16> to vector<128x40xbf16>
    %c0_2 = arith.constant 0 : index
    %c0_3 = arith.constant 0 : index
    %8 = vector.load %arg2[%c0_2, %c0_3] : memref<40x128xbf16, #tpu.memory_space<vmem>>, vector<40x128xbf16>
    %cst = arith.constant dense<0.000000e+00> : vector<128x128xf32>
    %9 = tpu.matmul %7, %8, %cst {dimension_numbers = #tpu.dot_dimension_numbers<[1], [0], [0], [1], [0, 0, 1, 1], [], []>} : vector<128x40xbf16>, vector<40x128xbf16>, vector<128x128xf32> -> vector<128x128xf32>
    %10 = vector.shape_cast %9 : vector<128x128xf32> to vector<2x64x128xf32>
    %c0_4 = arith.constant 0 : index
    %c0_5 = arith.constant 0 : index
    %11 = vector.load %arg3[%c0_4, %c0_5] : memref<1x128xf32, #tpu.memory_space<vmem>>, vector<1x128xf32>
    %12 = vector.shape_cast %11 : vector<1x128xf32> to vector<1x1x128xf32>
    %13 = vector.broadcast %12 : vector<1x1x128xf32> to vector<2x64x128xf32>
    %14 = arith.addf %10, %13 : vector<2x64x128xf32>
    %cst_6 = arith.constant 0.000000e+00 : f32
    %15 = vector.broadcast %cst_6 : f32 to vector<2x64x128xf32>
    %16 = arith.maximumf %14, %15 : vector<2x64x128xf32>
    %17 = vector.shape_cast %16 : vector<2x64x128xf32> to vector<2x32x256xf32>
    %18 = vector.extract_strided_slice %17 {offsets = [0, 0, 0], sizes = [2, 32, 128], strides = [1, 1, 1]} : vector<2x32x256xf32> to vector<2x32x128xf32>
    %19 = vector.extract_strided_slice %17 {offsets = [0, 0, 128], sizes = [2, 32, 128], strides = [1, 1, 1]} : vector<2x32x256xf32> to vector<2x32x128xf32>
    %20 = arith.maximumf %18, %19 : vector<2x32x128xf32>
    %21 = arith.truncf %20 : vector<2x32x128xf32> to vector<2x32x128xbf16>
    %22 = vector.shape_cast %21 : vector<2x32x128xbf16> to vector<64x128xbf16>
    %c0_7 = arith.constant 0 : index
    %c0_8 = arith.constant 0 : index
    %23 = vector.load %arg4[%c0_7, %c0_8] : memref<128x640xbf16, #tpu.memory_space<vmem>>, vector<128x640xbf16>
    %cst_9 = arith.constant dense<0.000000e+00> : vector<64x640xf32>
    %24 = tpu.matmul %22, %23, %cst_9 {dimension_numbers = #tpu.dot_dimension_numbers<[1], [0], [0], [1], [0, 0, 1, 1], [], []>} : vector<64x128xbf16>, vector<128x640xbf16>, vector<64x640xf32> -> vector<64x640xf32>
    %25 = vector.shape_cast %24 : vector<64x640xf32> to vector<2x32x640xf32>
    %26 = vector.extract_strided_slice %25 {offsets = [0, 0, 0], sizes = [2, 26, 128], strides = [1, 1, 1]} : vector<2x32x640xf32> to vector<2x26x128xf32>
    %27 = vector.extract_strided_slice %25 {offsets = [0, 1, 128], sizes = [2, 26, 128], strides = [1, 1, 1]} : vector<2x32x640xf32> to vector<2x26x128xf32>
    %28 = arith.addf %26, %27 : vector<2x26x128xf32>
    %29 = vector.extract_strided_slice %25 {offsets = [0, 2, 256], sizes = [2, 26, 128], strides = [1, 1, 1]} : vector<2x32x640xf32> to vector<2x26x128xf32>
    %30 = arith.addf %28, %29 : vector<2x26x128xf32>
    %31 = vector.extract_strided_slice %25 {offsets = [0, 3, 384], sizes = [2, 26, 128], strides = [1, 1, 1]} : vector<2x32x640xf32> to vector<2x26x128xf32>
    %32 = arith.addf %30, %31 : vector<2x26x128xf32>
    %33 = vector.extract_strided_slice %25 {offsets = [0, 4, 512], sizes = [2, 26, 128], strides = [1, 1, 1]} : vector<2x32x640xf32> to vector<2x26x128xf32>
    %34 = arith.addf %32, %33 : vector<2x26x128xf32>
    %c0_10 = arith.constant 0 : index
    %c0_11 = arith.constant 0 : index
    %35 = vector.load %arg5[%c0_10, %c0_11] : memref<1x128xf32, #tpu.memory_space<vmem>>, vector<1x128xf32>
    %36 = vector.shape_cast %35 : vector<1x128xf32> to vector<1x1x128xf32>
    %37 = vector.broadcast %36 : vector<1x1x128xf32> to vector<2x26x128xf32>
    %38 = arith.addf %34, %37 : vector<2x26x128xf32>
    %cst_12 = arith.constant 0.000000e+00 : f32
    %39 = vector.broadcast %cst_12 : f32 to vector<2x26x128xf32>
    %40 = arith.maximumf %38, %39 : vector<2x26x128xf32>
    %41 = vector.shape_cast %40 : vector<2x26x128xf32> to vector<2x13x256xf32>
    %42 = vector.extract_strided_slice %41 {offsets = [0, 0, 0], sizes = [2, 13, 128], strides = [1, 1, 1]} : vector<2x13x256xf32> to vector<2x13x128xf32>
    %43 = vector.extract_strided_slice %41 {offsets = [0, 0, 128], sizes = [2, 13, 128], strides = [1, 1, 1]} : vector<2x13x256xf32> to vector<2x13x128xf32>
    %44 = arith.maximumf %42, %43 : vector<2x13x128xf32>
    %c0_13 = arith.constant 0 : index
    %c0_14 = arith.constant 0 : index
    %c0_15 = arith.constant 0 : index
    %45 = vector.load %arg6[%c0_13, %c0_14, %c0_15] : memref<2x13x128xf32, #tpu.memory_space<vmem>>, vector<2x13x128xf32>
    tpu.vector_store %arg6[%c0_13, %c0_14, %c0_15], %44 {strides = array<i32>} : memref<2x13x128xf32, #tpu.memory_space<vmem>>, vector<2x13x128xf32>,
    return
  }
  func.func @transform_0(%arg0: i32) -> (i32, i32, i32) {
    %c0_i32 = arith.constant 0 : i32
    %c0_i32_0 = arith.constant 0 : i32
    %c0_i32_1 = arith.constant 0 : i32
    return %arg0, %c0_i32, %c0_i32_0 : i32, i32, i32
  }
  func.func @transform_1(%arg0: i32) -> (i32, i32) {
    %c0_i32 = arith.constant 0 : i32
    %c0_i32_0 = arith.constant 0 : i32
    %c0_i32_1 = arith.constant 0 : i32
    return %c0_i32, %c0_i32_0 : i32, i32
  }
  func.func @transform_2(%arg0: i32) -> (i32, i32) {
    %c0_i32 = arith.constant 0 : i32
    %c0_i32_0 = arith.constant 0 : i32
    %c0_i32_1 = arith.constant 0 : i32
    return %c0_i32, %c0_i32_0 : i32, i32
  }
  func.func @transform_3(%arg0: i32) -> (i32, i32) {
    %c0_i32 = arith.constant 0 : i32
    %c0_i32_0 = arith.constant 0 : i32
    %c0_i32_1 = arith.constant 0 : i32
    return %c0_i32, %c0_i32_0 : i32, i32
  }
  func.func @transform_4(%arg0: i32) -> (i32, i32) {
    %c0_i32 = arith.constant 0 : i32
    %c0_i32_0 = arith.constant 0 : i32
    %c0_i32_1 = arith.constant 0 : i32
    return %c0_i32, %c0_i32_0 : i32, i32
  }
  func.func @transform_5(%arg0: i32) -> (i32, i32, i32) {
    %c0_i32 = arith.constant 0 : i32
    %c0_i32_0 = arith.constant 0 : i32
    %c0_i32_1 = arith.constant 0 : i32
    return %arg0, %c0_i32, %c0_i32_0 : i32, i32, i32
  }
}

module attributes {stable_mosaic.version = 11 : i64} {
  func.func @_drug_backbone_kernel(%arg0: i32, %arg1: memref<2x68x8xbf16, #tpu.memory_space<vmem>>, %arg2: memref<40x128xbf16, #tpu.memory_space<vmem>>, %arg3: memref<1x128xf32, #tpu.memory_space<vmem>>, %arg4: memref<128x640xbf16, #tpu.memory_space<vmem>>, %arg5: memref<1x128xf32, #tpu.memory_space<vmem>>, %arg6: memref<2x13x128xf32, #tpu.memory_space<vmem>>) attributes {dimension_semantics = [#tpu.dimension_semantics<parallel>], iteration_bounds = array<i64: 1>, scalar_prefetch = 0 : i64, scratch_operands = 0 : i64, tpu.core_type = #tpu.core_type<tc>, window_params = [{transform_indices = @transform_0, window_bounds = array<i64: 2, 68, 8>}, {pipeline_mode = #tpu.pipeline_mode<synchronous>, transform_indices = @transform_1, window_bounds = array<i64: 40, 128>}, {pipeline_mode = #tpu.pipeline_mode<synchronous>, transform_indices = @transform_2, window_bounds = array<i64: 1, 128>}, {pipeline_mode = #tpu.pipeline_mode<synchronous>, transform_indices = @transform_3, window_bounds = array<i64: 128, 640>}, {pipeline_mode = #tpu.pipeline_mode<synchronous>, transform_indices = @transform_4, window_bounds = array<i64: 1, 128>}, {transform_indices = @transform_5, window_bounds = array<i64: 2, 13, 128>}]} {
    %c0 = arith.constant 0 : index
    %c0_0 = arith.constant 0 : index
    %c0_1 = arith.constant 0 : index
    %0 = vector.load %arg1[%c0, %c0_0, %c0_1] : memref<2x68x8xbf16, #tpu.memory_space<vmem>>, vector<2x68x8xbf16>
    %1 = vector.extract_strided_slice %0 {offsets = [0, 0, 0], sizes = [2, 64, 8], strides = [1, 1, 1]} : vector<2x68x8xbf16> to vector<2x64x8xbf16>
    %2 = vector.extract_strided_slice %0 {offsets = [0, 1, 0], sizes = [2, 64, 8], strides = [1, 1, 1]} : vector<2x68x8xbf16> to vector<2x64x8xbf16>
    %3 = vector.extract_strided_slice %0 {offsets = [0, 2, 0], sizes = [2, 64, 8], strides = [1, 1, 1]} : vector<2x68x8xbf16> to vector<2x64x8xbf16>
    %4 = vector.extract_strided_slice %0 {offsets = [0, 3, 0], sizes = [2, 64, 8], strides = [1, 1, 1]} : vector<2x68x8xbf16> to vector<2x64x8xbf16>
    %5 = vector.extract_strided_slice %0 {offsets = [0, 4, 0], sizes = [2, 64, 8], strides = [1, 1, 1]} : vector<2x68x8xbf16> to vector<2x64x8xbf16>
    %6 = tpu.concatenate %1, %2, %3, %4, %5 in 2 : vector<2x64x8xbf16>, vector<2x64x8xbf16>, vector<2x64x8xbf16>, vector<2x64x8xbf16>, vector<2x64x8xbf16> -> vector<2x64x40xbf16>
    %7 = vector.shape_cast %6 : vector<2x64x40xbf16> to vector<128x40xbf16>
    %c0_2 = arith.constant 0 : index
    %c0_3 = arith.constant 0 : index
    %8 = vector.load %arg2[%c0_2, %c0_3] : memref<40x128xbf16, #tpu.memory_space<vmem>>, vector<40x128xbf16>
    %cst = arith.constant dense<0.000000e+00> : vector<128x128xf32>
    %9 = tpu.matmul %7, %8, %cst {dimension_numbers = #tpu.dot_dimension_numbers<[1], [0], [0], [1], [0, 0, 1, 1], [], []>} : vector<128x40xbf16>, vector<40x128xbf16>, vector<128x128xf32> -> vector<128x128xf32>
    %10 = vector.shape_cast %9 : vector<128x128xf32> to vector<2x64x128xf32>
    %c0_4 = arith.constant 0 : index
    %c0_5 = arith.constant 0 : index
    %11 = vector.load %arg3[%c0_4, %c0_5] : memref<1x128xf32, #tpu.memory_space<vmem>>, vector<1x128xf32>
    %12 = vector.shape_cast %11 : vector<1x128xf32> to vector<1x1x128xf32>
    %13 = vector.broadcast %12 : vector<1x1x128xf32> to vector<2x64x128xf32>
    %14 = arith.addf %10, %13 : vector<2x64x128xf32>
    %cst_6 = arith.constant 0.000000e+00 : f32
    %15 = vector.broadcast %cst_6 : f32 to vector<2x64x128xf32>
    %16 = arith.maximumf %14, %15 : vector<2x64x128xf32>
    %17 = vector.shape_cast %16 : vector<2x64x128xf32> to vector<2x32x256xf32>
    %18 = vector.extract_strided_slice %17 {offsets = [0, 0, 0], sizes = [2, 32, 128], strides = [1, 1, 1]} : vector<2x32x256xf32> to vector<2x32x128xf32>
    %19 = vector.extract_strided_slice %17 {offsets = [0, 0, 128], sizes = [2, 32, 128], strides = [1, 1, 1]} : vector<2x32x256xf32> to vector<2x32x128xf32>
    %20 = arith.maximumf %18, %19 : vector<2x32x128xf32>
    %21 = arith.truncf %20 : vector<2x32x128xf32> to vector<2x32x128xbf16>
    %22 = vector.shape_cast %21 : vector<2x32x128xbf16> to vector<64x128xbf16>
    %c0_7 = arith.constant 0 : index
    %c0_8 = arith.constant 0 : index
    %23 = vector.load %arg4[%c0_7, %c0_8] : memref<128x640xbf16, #tpu.memory_space<vmem>>, vector<128x640xbf16>
    %cst_9 = arith.constant dense<0.000000e+00> : vector<64x640xf32>
    %24 = tpu.matmul %22, %23, %cst_9 {dimension_numbers = #tpu.dot_dimension_numbers<[1], [0], [0], [1], [0, 0, 1, 1], [], []>} : vector<64x128xbf16>, vector<128x640xbf16>, vector<64x640xf32> -> vector<64x640xf32>
    %25 = vector.shape_cast %24 : vector<64x640xf32> to vector<2x32x640xf32>
    %26 = vector.extract_strided_slice %25 {offsets = [0, 0, 0], sizes = [2, 26, 128], strides = [1, 1, 1]} : vector<2x32x640xf32> to vector<2x26x128xf32>
    %27 = vector.extract_strided_slice %25 {offsets = [0, 1, 128], sizes = [2, 26, 128], strides = [1, 1, 1]} : vector<2x32x640xf32> to vector<2x26x128xf32>
    %28 = arith.addf %26, %27 : vector<2x26x128xf32>
    %29 = vector.extract_strided_slice %25 {offsets = [0, 2, 256], sizes = [2, 26, 128], strides = [1, 1, 1]} : vector<2x32x640xf32> to vector<2x26x128xf32>
    %30 = arith.addf %28, %29 : vector<2x26x128xf32>
    %31 = vector.extract_strided_slice %25 {offsets = [0, 3, 384], sizes = [2, 26, 128], strides = [1, 1, 1]} : vector<2x32x640xf32> to vector<2x26x128xf32>
    %32 = arith.addf %30, %31 : vector<2x26x128xf32>
    %33 = vector.extract_strided_slice %25 {offsets = [0, 4, 512], sizes = [2, 26, 128], strides = [1, 1, 1]} : vector<2x32x640xf32> to vector<2x26x128xf32>
    %34 = arith.addf %32, %33 : vector<2x26x128xf32>
    %c0_10 = arith.constant 0 : index
    %c0_11 = arith.constant 0 : index
    %35 = vector.load %arg5[%c0_10, %c0_11] : memref<1x128xf32, #tpu.memory_space<vmem>>, vector<1x128xf32>
    %36 = vector.shape_cast %35 : vector<1x128xf32> to vector<1x1x128xf32>
    %37 = vector.broadcast %36 : vector<1x1x128xf32> to vector<2x26x128xf32>
    %38 = arith.addf %34, %37 : vector<2x26x128xf32>
    %cst_12 = arith.constant 0.000000e+00 : f32
    %39 = vector.broadcast %cst_12 : f32 to vector<2x26x128xf32>
    %40 = arith.maximumf %38, %39 : vector<2x26x128xf32>
    %41 = vector.shape_cast %40 : vector<2x26x128xf32> to vector<2x13x256xf32>
    %42 = vector.extract_strided_slice %41 {offsets = [0, 0, 0], sizes = [2, 13, 128], strides = [1, 1, 1]} : vector<2x13x256xf32> to vector<2x13x128xf32>
    %43 = vector.extract_strided_slice %41 {offsets = [0, 0, 128], sizes = [2, 13, 128], strides = [1, 1, 1]} : vector<2x13x256xf32> to vector<2x13x128xf32>
    %44 = arith.maximumf %42, %43 : vector<2x13x128xf32>
    %c0_13 = arith.constant 0 : index
    %c0_14 = arith.constant 0 : index
    %c0_15 = arith.constant 0 : index
    %45 = vector.load %arg6[%c0_13, %c0_14, %c0_15] : memref<2x13x128xf32, #tpu.memory_space<vmem>>, vector<2x13x128xf32>
    tpu.vector_store %arg6[%c0_13, %c0_14, %c0_15], %44 {strides = array<i32>} : memref<2x13x128xf32, #tpu.memory_space<vmem>>, vector<2x13x128xf32>,
    return
  }
  func.func @transform_0(%arg0: i32) -> (i32, i32, i32) {
    %c0_i32 = arith.constant 0 : i32
    %c0_i32_0 = arith.constant 0 : i32
    %c0_i32_1 = arith.constant 0 : i32
    return %arg0, %c0_i32, %c0_i32_0 : i32, i32, i32
  }
  func.func @transform_1(%arg0: i32) -> (i32, i32) {
    %c0_i32 = arith.constant 0 : i32
    %c0_i32_0 = arith.constant 0 : i32
    %c0_i32_1 = arith.constant 0 : i32
    return %c0_i32, %c0_i32_0 : i32, i32
  }
  func.func @transform_2(%arg0: i32) -> (i32, i32) {
    %c0_i32 = arith.constant 0 : i32
    %c0_i32_0 = arith.constant 0 : i32
    %c0_i32_1 = arith.constant 0 : i32
    return %c0_i32, %c0_i32_0 : i32, i32
  }
  func.func @transform_3(%arg0: i32) -> (i32, i32) {
    %c0_i32 = arith.constant 0 : i32
    %c0_i32_0 = arith.constant 0 : i32
    %c0_i32_1 = arith.constant 0 : i32
    return %c0_i32, %c0_i32_0 : i32, i32
  }
  func.func @transform_4(%arg0: i32) -> (i32, i32) {
    %c0_i32 = arith.constant 0 : i32
    %c0_i32_0 = arith.constant 0 : i32
    %c0_i32_1 = arith.constant 0 : i32
    return %c0_i32, %c0_i32_0 : i32, i32
  }
  func.func @transform_5(%arg0: i32) -> (i32, i32, i32) {
    %c0_i32 = arith.constant 0 : i32
    %c0_i32_0 = arith.constant 0 : i32
    %c0_i32_1 = arith.constant 0 : i32
    return %arg0, %c0_i32, %c0_i32_0 : i32, i32, i32
  }
}

</mosaic_0001>

<bundles_post_ra>
// kernel: tpu_custom_call.1
= control target key start
LH: loop header
LB: loop body
LE: loop exit
PB: predicated region body
PF: predicated region fallthrough
CT: control target
= control target key end

     0   :  { %10 = vsyncpa [#allocation3], 0  ;;  %s1718_s21 = smov [#allocation2]   ;;  %s1719_s23 = smov 320   ;;  %s2124_s0 = inlined_call_operand.vmem [shape: bf16[2,68,8], index: 0, kind: input, shape index: {}]   ;;  %s2125_s1 = inlined_call_operand.vmem [shape: bf16[40,128], index: 1, kind: input, shape index: {}]   ;;  %s2126_s2 = inlined_call_operand.vmem [shape: f32[1,128], index: 2, kind: input, shape index: {}]   ;;  %s2127_s3 = inlined_call_operand.hbm [shape: bf16[128,640], index: 3, kind: input, shape index: {}]   ;;  %s2128_s4 = inlined_call_operand.vmem [shape: f32[1,128], index: 4, kind: input, shape index: {}]   ;;  %s2129_s5 = inlined_call_operand.vmem [shape: f32[2,13,128], index: 5, kind: output, shape index: {}]  }
   0x1   :  { %s21_s20 = sshll.u32 %s2127_s3, 4  ;;  %s23_s22 = sshll.u32 %s1718_s21, 4  ;;  %s22_s20 = int_to_ptr.hbm [resolvable:$true] %s21_s20  ;;  %s24_s22 = int_to_ptr.vmem [resolvable:$true] %s23_s22 }
   0x2   :  { %s1720_s24 = smov 20  }
   0x3   :  { %29 = dma.hbm_to_vmem [thread:$0]  %s22_s20, 5120, %s24_s22, [#allocation3], %s1719_s23, %s1719_s23, %s1720_s24  }
   0x4   :  { %1716 = dma.done.wait [#allocation3], 5120  }
   0x5   :  { %1717 = vsyncadd [#allocation3], 4294962176  ;;  %v1762_v0 = vld [vmem:[%s2124_s0] sm:$0xff]  ;;  %v1767_v1 = vld [vmem:[%s2124_s0 + $0x8] sm:$0xff]  ;;  %vm101_vm0 = vsmask.f32 7424 }
   0x6   :  { %v103_v2 = vshrl.u32 %v1762_v0, 16  ;;  %v105_v3 = vshll.u32 %v1762_v0, 16  ;;  %v110_v4 = vshll.u32 %v1767_v1, 16  ;;  %v114_v5 = vshrl.u32 %v1767_v1, 16  ;;  %v1776_v6 = vld [vmem:[%s2124_s0 + $0x10] sm:$0xff]  ;;  %s1721_s30 = smov 8  }
   0x7   :  { %vm225_vm1 = vsmask.f32 6400  ;;  %v118_v15 = vshll.u32 %v1776_v6, 16  ;;  %s1722_s6 = smov 24   ;;  %v191_v21 = vrot.slane %v1762_v0, 1  ;;  %v192_v22 = vrot.slane %v1767_v1, 1 }
   0x8   :  { %v107_v7 = vrot.slane %v105_v3, 1  ;;  %v112_v8 = vrot.slane %v110_v4, 1  ;;  %v226_v9 = vrot.slane %v103_v2, 1  ;;  %v227_v10 = vrot.slane %v105_v3, 2  ;;  %v1796_v32 = vld [vmem:[%s2124_s0 + $0x18] sm:$0xff]  ;;  %s1723_s9 = smov 16  }
   0x9   :  { %v229_v11 = vrot.slane %v114_v5, 1  ;;  %v230_v12 = vrot.slane %v110_v4, 2  ;;  %v120_v19 = vrot.slane %v118_v15, 1  ;;  %v122_v23 = vshrl.u32 %v1776_v6, 16  ;;  %s1724_s10 = smov 32   ;;  %v1821_v55 = vld [vmem:[%s2124_s0 + $0x24] sm:$0xff] }
   0xa   :  { %v108_v13 = vor.u32 %v107_v7, %v103_v2  ;;  %v228_v14 = vor.u32 %v227_v10, %v226_v9  ;;  %v116_v17 = vor.u32 %v114_v5, %v112_v8  ;;  %vm190_vm2 = vcmask 1046528   ;;  %v45_v38 = vld [vmem:[%s2124_s0 + $0x20] sm:$0x3]  ;;  %v1830_v62 = vld [vmem:[%s2124_s0 + $0x2c] sm:$0xff] }
   0xb   :  { %v231_v16 = vor.u32 %v230_v12, %v229_v11  ;;  %v285_v25 = vrot.slane %v1762_v0, 2  ;;  %v286_v26 = vrot.slane %v1767_v1, 2  ;;  %vm284_vm3 = vcmask 1045504  }
   0xc   :  { %v113_v18 = vsel %vm101_vm0, %v108_v13, %v112_v8  ;;  %v121_v24 = vsel %vm101_vm0, %v116_v17, %v120_v19  ;;  %v193_v27 = vsel %vm190_vm2, %v191_v21, %v192_v22  ;;  %v233_v28 = vrot.slane %v122_v23, 1 }
   0xd   :  { %174 = vrot.lane.b32.xlu0 %v113_v18, %s1721_s30  ;;  %v232_v20 = vsel %vm225_vm1, %v228_v14, %v231_v16  ;;  %176 = vrot.lane.b32.xlu2 %v121_v24, %s1721_s30  ;;  %v234_v29 = vrot.slane %v118_v15, 2  ;;  %v194_v30 = vrot.slane %v1776_v6, 1  ;;  %v287_v31 = vsel %vm284_vm3, %v285_v25, %v286_v26 }
   0xe   :  { %268 = vrot.lane.b32.xlu1 %v232_v20, %s1722_s6  ;;  %v288_v35 = vrot.slane %v1776_v6, 2  ;;  %v126_v36 = vshll.u32 %v1796_v32, 16  ;;  %v130_v37 = vshrl.u32 %v1796_v32, 16  ;;  %v124_v39 = vor.u32 %v122_v23, %v120_v19 }
   0xf   :  { %v195_v33 = vsel %vm190_vm2, %v192_v22, %v194_v30  ;;  %v235_v34 = vor.u32 %v234_v29, %v233_v28  ;;  %v97_v41 = vunpack.c.l.b16 %v45_v38  ;;  %v196_v47 = vrot.slane %v1796_v32, 1  ;;  %v1849_v22 = vld [vmem:[%s2124_s0 + $0x34] sm:$0xff] }
  0x10   :  { %v128_v42 = vrot.slane %v126_v36, 1  ;;  %v289_v43 = vsel %vm284_vm3, %v286_v26, %v288_v35  ;;  %v237_v44 = vrot.slane %v130_v37, 1  ;;  %v238_v45 = vrot.slane %v126_v36, 2 }
  0x11   :  { %v236_v40 = vsel %vm225_vm1, %v231_v16, %v235_v34  ;;  %v99_v48 = vpack.c.b16 %v97_v41, %v97_v41  ;;  %v197_v51 = vsel %vm190_vm2, %v194_v30, %v196_v47  ;;  %v290_v53 = vrot.slane %v1796_v32, 2  ;;  %v54_v41 = vld [vmem:[%s2124_s0 + $0x44] sm:$0x3] }
  0x12   :  { %v129_v46 = vsel %vm101_vm0, %v124_v39, %v128_v42  ;;  %v239_v49 = vor.u32 %v238_v45, %v237_v44  ;;  %v132_v59 = vor.u32 %v130_v37, %v128_v42  ;;  %v141_v63 = vshll.u32 %v1821_v55, 16  ;;  %v1868_v39 = vld [vmem:[%s2124_s0 + $0x3c] sm:$0xff] }
  0x13   :  { %v241_v50 = vshrl.u32 %v99_v48, 16  ;;  %v134_v52 = vshll.u32 %v99_v48, 16  ;;  %v291_v56 = vsel %vm284_vm3, %v288_v35, %v290_v53  ;;  %v198_v61 = vrot.slane %v99_v48, 1 }
  0x14   :  { %v240_v54 = vsel %vm225_vm1, %v235_v34, %v239_v49  ;;  %v139_v5 = vshrl.u32 %v1821_v55, 16  ;;  %v143_v7 = vrot.slane %v141_v63, 1  ;;  %v146_v8 = vshll.u32 %v1830_v62, 16 }
  0x15   :  { %209 = vrot.lane.b32.xlu0 %v193_v27, %s1723_s9  ;;  %211 = vrot.lane.b32.xlu2 %v195_v33, %s1723_s9  ;;  %v243_v57 = vrot.slane %v241_v50, 1  ;;  %v244_v58 = vrot.slane %v134_v52, 2  ;;  %v136_v60 = vrot.slane %v134_v52, 1  ;;  %v199_v4 = vsel %vm190_vm2, %v196_v47, %v198_v61 }
  0x16   :  { %303 = vrot.lane.b32.xlu1 %v287_v31, %s1724_s10  ;;  %v292_v10 = vrot.slane %v99_v48, 2  ;;  %v150_v11 = vshrl.u32 %v1830_v62, 16  ;;  %v144_v12 = vor.u32 %v143_v7, %v139_v5  ;;  %v148_v13 = vrot.slane %v146_v8, 1 }
  0x17   :  { %v245_v2 = vor.u32 %v244_v58, %v243_v57  ;;  %v137_v3 = vsel %vm101_vm0, %v132_v59, %v136_v60  ;;  %v200_v14 = vrot.slane %v1821_v55, 1  ;;  %v247_v16 = vrot.slane %v139_v5, 1 }
  0x18   :  { %v293_v15 = vsel %vm284_vm3, %v290_v53, %v292_v10  ;;  %v248_v17 = vrot.slane %v141_v63, 2  ;;  %v250_v18 = vrot.slane %v150_v11, 1  ;;  %v251_v19 = vrot.slane %v146_v8, 2  ;;  %v391_v63 = vld [vmem:[%s2125_s1 + $0x10] sm:$0xf] }
  0x19   :  { %v246_v9 = vsel %vm225_vm1, %v239_v49, %v245_v2  ;;  %v201_v20 = vrot.slane %v1830_v62, 1  ;;  %v149_v21 = vsel %vm101_vm0, %v144_v12, %v148_v13  ;;  %v294_v26 = vrot.slane %v1821_v55, 2 }
  0x1a   :  { %v249_v24 = vor.u32 %v248_v17, %v247_v16  ;;  %v252_v25 = vor.u32 %v251_v19, %v250_v18  ;;  %v295_v27 = vrot.slane %v1830_v62, 2  ;;  %v154_v28 = vshll.u32 %v1849_v22, 16  ;;  %v1624_v17 = vld [vmem:[%s2125_s1] sm:$0xff] }
  0x1b   :  { %v202_v23 = vsel %vm190_vm2, %v200_v14, %v201_v20  ;;  %v158_v29 = vshrl.u32 %v1849_v22, 16  ;;  %v152_v30 = vor.u32 %v150_v11, %v148_v13  ;;  %v203_v38 = vrot.slane %v1849_v22, 1 }
  0x1c   :  { %v253_v31 = vsel %vm225_vm1, %v249_v24, %v252_v25  ;;  %v156_v33 = vrot.slane %v154_v28, 1  ;;  %v296_v34 = vsel %vm284_vm3, %v294_v26, %v295_v27  ;;  %v255_v36 = vrot.slane %v154_v28, 2 }
  0x1d   :  { %270 = vrot.lane.b32.xlu0 %v236_v40, %s1722_s6  ;;  %178 = vrot.lane.b32.xlu2 %v129_v46, %s1721_s30  ;;  %v254_v35 = vrot.slane %v158_v29, 1  ;;  %v204_v42 = vsel %vm190_vm2, %v201_v20, %v203_v38  ;;  %v297_v44 = vrot.slane %v1849_v22, 2  ;;  %v98_v46 = vunpack.c.l.b16 %v54_v41 }
  0x1e   :  { %305 = vrot.lane.b32.xlu1 %v289_v43, %s1724_s10  ;;  %v157_v37 = vsel %vm101_vm0, %v152_v30, %v156_v33  ;;  %v162_v43 = vshll.u32 %v1868_v39, 16  ;;  %v160_v48 = vor.u32 %v158_v29, %v156_v33  ;;  %v205_v50 = vrot.slane %v1868_v39, 1 }
  0x1f   :  { %v256_v40 = vor.u32 %v255_v36, %v254_v35  ;;  %v298_v47 = vsel %vm284_vm3, %v295_v27, %v297_v44  ;;  %v299_v57 = vrot.slane %v1868_v39, 2  ;;  %vm424_vm4 = vcmask 1043456  }
  0x20   :  { %v164_v49 = vrot.slane %v162_v43, 1  ;;  %v206_v53 = vsel %vm190_vm2, %v203_v38, %v205_v50  ;;  %v259_v5 = vrot.slane %v162_v43, 2  ;;  %vm319_vm5 = vcmask 64512  }
  0x21   :  { %v257_v45 = vsel %vm225_vm1, %v252_v25, %v256_v40  ;;  %v300_v60 = vsel %vm284_vm3, %v297_v44, %v299_v57  ;;  %vm336_vm6 = vcmask 130048   ;;  %vm353_vm7 = vcmask 195584  }
  0x22   :  { %v165_v52 = vsel %vm101_vm0, %v160_v48, %v164_v49  ;;  %vm370_vm8 = vcmask 261120   ;;  %vm407_vm9 = vcmask 326656   ;;  %vm1215_vm10 = vcmask 1044480  }
  0x25   :  { %213 = vrot.lane.b32.xlu0 %v197_v51, %s1723_s9  ;;  %307 = vrot.lane.b32.xlu2 %v291_v56, %s1724_s10  ;;  %v100_v51 = vpack.c.b16 %v98_v46, %v98_v46 }
  0x26   :  { %272 = vrot.lane.b32.xlu1 %v240_v54, %s1722_s6  ;;  %v166_v54 = vshrl.u32 %v1868_v39, 16 }
  0x27   :  { %v170_v56 = vshll.u32 %v100_v51, 16  ;;  %v262_v2 = vshrl.u32 %v100_v51, 16  ;;  %v301_v13 = vrot.slane %v100_v51, 2  ;;  %v207_v19 = vrot.slane %v100_v51, 1 }
  0x28   :  { %v168_v58 = vor.u32 %v166_v54, %v164_v49 }
  0x29   :  { %v172_v59 = vrot.slane %v170_v56, 1  ;;  %v264_v7 = vrot.slane %v262_v2, 1  ;;  %v265_v8 = vrot.slane %v170_v56, 2  ;;  %v302_v16 = vsel %vm284_vm3, %v299_v57, %v301_v13 }
  0x2a   :  { %v208_v20 = vsel %vm190_vm2, %v205_v50, %v207_v19 }
  0x2b   :  { %v173_v61 = vsel %vm101_vm0, %v168_v58, %v172_v59  ;;  %v266_v11 = vor.u32 %v265_v8, %v264_v7 }
  0x2d   :  { %180 = vrot.lane.b32.xlu0 %v137_v3, %s1721_s30  ;;  %274 = vrot.lane.b32.xlu2 %v246_v9, %s1722_s6  ;;  %v401_v3 = vunpack.c.l.b16 %v391_v63 }
  0x2e   :  { %215 = vrot.lane.b32.xlu1 %v199_v4, %s1723_s9  ;;  %v258_v4 = vrot.slane %v166_v54, 1 }
  0x2f   :  { %v404_v9 = vpack.c.b16 %v401_v3, %v401_v3 }
  0x30   :  { %v260_v10 = vor.u32 %v259_v5, %v258_v4 }
  0x31   :  { %v426_v12 = vsel %vm424_vm4, %v404_v9, 0 }
  0x32   :  { %433 = vmatpush.bf16.msra.mxu0 %v426_v12  ;;  %v267_v14 = vsel %vm225_vm1, %v260_v10, %v266_v11  ;;  %v261_v18 = vsel %vm225_vm1, %v256_v40, %v260_v10 }
  0x35   :  { %309 = vrot.lane.b32.xlu0 %v293_v15, %s1724_s10  ;;  %217 = vrot.lane.b32.xlu2 %v202_v23, %s1723_s9  ;;  %v1625_v15 = vld [vmem:[%s2125_s1 + $0x8] sm:$0xff] }
  0x36   :  { %182 = vrot.lane.b32.xlu1 %v149_v21, %s1721_s30  ;;  %434 = vmatpush.bf16.msra.mxu0 %v1625_v15 }
  0x3a   :  { %435 = vmatpush.bf16.msra.mxu0 %v1624_v17 }
  0x3d   :  { %276 = vrot.lane.b32.xlu0 %v253_v31, %s1722_s6  ;;  %184 = vrot.lane.b32.xlu2 %v157_v37, %s1721_s30 }
  0x3e   :  { %311 = vrot.lane.b32.xlu1 %v296_v34, %s1724_s10 }
  0x45   :  { %219 = vrot.lane.b32.xlu0 %v204_v42, %s1723_s9  ;;  %313 = vrot.lane.b32.xlu2 %v298_v47, %s1724_s10 }
  0x46   :  { %278 = vrot.lane.b32.xlu1 %v257_v45, %s1722_s6 }
  0x4d   :  { %186 = vrot.lane.b32.xlu0 %v165_v52, %s1721_s30  ;;  %280 = vrot.lane.b32.xlu2 %v261_v18, %s1722_s6 }
  0x4e   :  { %221 = vrot.lane.b32.xlu1 %v206_v53, %s1723_s9 }
  0x55   :  { %315 = vrot.lane.b32.xlu0 %v300_v60, %s1724_s10  ;;  %223 = vrot.lane.b32.xlu2 %v208_v20, %s1723_s9 }
  0x56   :  { %188 = vrot.lane.b32.xlu1 %v173_v61, %s1721_s30 }
  0x5d   :  { %282 = vrot.lane.b32.xlu0 %v267_v14, %s1722_s6 }
  0x5e   :  { %317 = vrot.lane.b32.xlu1 %v302_v16, %s1724_s10 }
  0x67   :  { %v177_v26 = vpop.permute.xlu2 %176 }
  0x68   :  { %v323_v31 = vsel %vm319_vm5, %v1767_v1, %v177_v26  ;;  %v1600_v26 = vld [vmem:[#allocation2 + $0x12c] sm:$0xf0] }
  0x6f   :  { %v212_v33 = vpop.permute.xlu2 %211 }
  0x70   :  { %v340_v34 = vsel %vm336_vm6, %v323_v31, %v212_v33  ;;  %v1580_v33 = vld [vmem:[#allocation2 + $0x104] sm:$0xf0] }
  0x77   :  { %v179_v38 = vpop.permute.xlu2 %178 }
  0x78   :  { %v325_v40 = vsel %vm319_vm5, %v1776_v6, %v179_v38  ;;  %v1560_v38 = vld [vmem:[#allocation2 + $0xdc] sm:$0xf0] }
  0x7f   :  { %v175_v21 = vpop.permute.xlu0 %174  ;;  %v308_v44 = vpop.permute.xlu2 %307 }
  0x80   :  { %v269_v23 = vpop.permute.xlu1 %268  ;;  %v321_v24 = vsel %vm319_vm5, %v1762_v0, %v175_v21  ;;  %v1598_v21 = vld [vmem:[#allocation2 + $0x118] sm:$0xf] }
  0x87   :  { %v210_v25 = vpop.permute.xlu0 %209  ;;  %v275_v50 = vpop.permute.xlu2 %274 }
  0x88   :  { %v338_v27 = vsel %vm336_vm6, %v321_v24, %v210_v25  ;;  %v304_v28 = vpop.permute.xlu1 %303  ;;  %v1661_v24 = vld [vmem:[#allocation2 + $0x11c] sm:$0xf] }
  0x89   :  { %v355_v29 = vsel %vm353_vm7, %v338_v27, %v269_v23  ;;  %v1663_v23 = vld [vmem:[#allocation2 + $0x128] sm:$0xf0]  ;;  %v1603_v27 = vor.u32 %v1661_v24, %v1600_v26 }
  0x8a   :  { %v372_v30 = vsel %vm370_vm8, %v355_v29, %v304_v28  ;;  %v1599_v25 = vor.u32 %v1663_v23, %v1598_v21  ;;  %v1658_v29 = vld [vmem:[#allocation2 + $0x100] sm:$0xf0] }
  0x8b   :  { %1448 = vmatmul.msk.bf16.vlgmr.msra.gmra.mxu0 %vm407_vm9, %v372_v30  ;;  %1013 = vmatpush.bf16.msra.mxu2 %v1603_v27  ;;  %v1656_v30 = vld [vmem:[#allocation2 + $0xf4] sm:$0xf] }
  0x8c   :  { %984 = vmatpush.bf16.msra.mxu1 %v1599_v25  ;;  %1666 = vmatpush.bf16.msra.mxu3 %v1599_v25 }
  0x8f   :  { %v271_v0 = vpop.permute.xlu0 %270  ;;  %v218_v56 = vpop.permute.xlu2 %217 }
  0x90   :  { %v357_v35 = vsel %vm353_vm7, %v340_v34, %v271_v0  ;;  %v306_v36 = vpop.permute.xlu1 %305  ;;  %v1583_v34 = vor.u32 %v1656_v30, %v1580_v33  ;;  %v1558_v0 = vld [vmem:[#allocation2 + $0xc8] sm:$0xf] }
  0x91   :  { %v374_v37 = vsel %vm370_vm8, %v357_v35, %v306_v36  ;;  %v1653_v35 = vld [vmem:[#allocation2 + $0xd8] sm:$0xf0]  ;;  %v1651_v36 = vld [vmem:[#allocation2 + $0xcc] sm:$0xf] }
  0x92   :  { %1014 = vmatpush.bf16.msra.mxu2 %v1583_v34  ;;  %v1662_v34 = vld [vmem:[#allocation2 + $0x124] sm:$0xf] }
  0x97   :  { %v214_v41 = vpop.permute.xlu0 %213  ;;  %v185_v61 = vpop.permute.xlu2 %184 }
  0x98   :  { %v342_v42 = vsel %vm336_vm6, %v325_v40, %v214_v41  ;;  %v273_v43 = vpop.permute.xlu1 %272  ;;  %v331_v63 = vsel %vm319_vm5, %v1830_v62, %v185_v61  ;;  %v1563_v40 = vor.u32 %v1651_v36, %v1560_v38  ;;  %v1538_v41 = vld [vmem:[#allocation2 + $0xa0] sm:$0xf]  ;;  %v1636_v61 = vld [vmem:[#allocation2 + $0x54] sm:$0xf] }
  0x99   :  { %v359_v1 = vsel %vm353_vm7, %v342_v42, %v273_v43  ;;  %v1648_v42 = vld [vmem:[#allocation2 + $0xb0] sm:$0xf0]  ;;  %v1646_v43 = vld [vmem:[#allocation2 + $0xa4] sm:$0xf] }
  0x9a   :  { %v376_v45 = vsel %vm370_vm8, %v359_v1, %v308_v44  ;;  %1015 = vmatpush.bf16.msra.mxu2 %v1563_v40  ;;  %v1539_v1 = vor.u32 %v1648_v42, %v1538_v41  ;;  %v1540_v44 = vld [vmem:[#allocation2 + $0xb4] sm:$0xf0]  ;;  %v1657_v41 = vld [vmem:[#allocation2 + $0xfc] sm:$0xf]  ;;  %v1588_v42 = vld [vmem:[#allocation2 + $0x10c] sm:$0xf0] }
  0x9b   :  { %1449 = vmatmul.msk.bf16.gmra.mxu0 %vm407_vm9, %v374_v37  ;;  %v1559_v37 = vor.u32 %v1653_v35, %v1558_v0  ;;  %v1608_v0 = vld [vmem:[#allocation2 + $0x134] sm:$0xf0] }
  0x9c   :  { %v1611_v36 = vor.u32 %v1662_v34, %v1608_v0 }
  0x9f   :  { %v181_v46 = vpop.permute.xlu0 %180  ;;  %v314_v5 = vpop.permute.xlu2 %313 }
  0xa0   :  { %v327_v47 = vsel %vm319_vm5, %v1796_v32, %v181_v46  ;;  %v216_v48 = vpop.permute.xlu1 %215  ;;  %v1725_v46 = vmov 1966171168  }
  0xa1   :  { %v344_v49 = vsel %vm336_vm6, %v327_v47, %v216_v48  ;;  %v514_v47 = vunpack.c.l.s4 %v1725_v46  ;;  %v1543_v48 = vor.u32 %v1646_v43, %v1540_v44 }
  0xa2   :  { %v361_v6 = vsel %vm353_vm7, %v344_v49, %v275_v50  ;;  %v1518_v49 = vld [vmem:[#allocation2 + $0x78] sm:$0xf]  ;;  %v1643_v50 = vld [vmem:[#allocation2 + $0x88] sm:$0xf0] }
  0xa3   :  { %1016 = vmatpush.bf16.msra.mxu2 %v1543_v48  ;;  %v1568_v48 = vld [vmem:[#allocation2 + $0xe4] sm:$0xf0] }
  0xa7   :  { %v310_v51 = vpop.permute.xlu0 %309  ;;  %v281_v12 = vpop.permute.xlu2 %280 }
  0xa8   :  { %v378_v52 = vsel %vm370_vm8, %v361_v6, %v310_v51  ;;  %v183_v53 = vpop.permute.xlu1 %182  ;;  %v1641_v6 = vld [vmem:[#allocation2 + $0x7c] sm:$0xf] }
  0xa9   :  { %v329_v54 = vsel %vm319_vm5, %v1821_v55, %v183_v53  ;;  %v1520_v53 = vld [vmem:[#allocation2 + $0x8c] sm:$0xf0] }
  0xaa   :  { %v346_v57 = vsel %vm336_vm6, %v329_v54, %v218_v56  ;;  %v1965_v56 = vunpack.c.0.s8 %v514_v47  ;;  %v1652_v47 = vld [vmem:[#allocation2 + $0xd4] sm:$0xf] }
  0xab   :  { %1450 = vmatmul.msk.bf16.gmra.mxu0 %vm407_vm9, %v376_v45  ;;  %v1962_v45 = vld [vmem:[%s2126_s2] ss:$0 sm:$0xff] }
  0xaf   :  { %v277_v58 = vpop.permute.xlu0 %276  ;;  %v224_v17 = vpop.permute.xlu2 %223 }
  0xb0   :  { %v363_v32 = vsel %vm353_vm7, %v346_v57, %v277_v58  ;;  %v312_v59 = vpop.permute.xlu1 %311  ;;  %v1523_v57 = vor.u32 %v1641_v6, %v1520_v53 }
  0xb1   :  { %v380_v60 = vsel %vm370_vm8, %v363_v32, %v312_v59  ;;  %v1498_v32 = vld [vmem:[#allocation2 + $0x50] sm:$0xf]  ;;  %v1638_v59 = vld [vmem:[#allocation2 + $0x60] sm:$0xf0] }
  0xb2   :  { %1017 = vmatpush.bf16.msra.mxu2 %v1523_v57 }
  0xb7   :  { %v220_v2 = vpop.permute.xlu0 %219 }
  0xb8   :  { %v348_v3 = vsel %vm336_vm6, %v331_v63, %v220_v2  ;;  %v279_v4 = vpop.permute.xlu1 %278  ;;  %v1500_v63 = vld [vmem:[#allocation2 + $0x64] sm:$0xf0] }
  0xb9   :  { %v365_v55 = vsel %vm353_vm7, %v348_v3, %v279_v4  ;;  %v1503_v3 = vor.u32 %v1636_v61, %v1500_v63 }
  0xba   :  { %v382_v7 = vsel %vm370_vm8, %v365_v55, %v314_v5  ;;  %v1478_v55 = vld [vmem:[#allocation2 + $0x28] sm:$0xf]  ;;  %v1633_v5 = vld [vmem:[#allocation2 + $0x38] sm:$0xf0] }
  0xbb   :  { %1451 = vmatmul.msk.bf16.gmra.mxu0 %vm407_vm9, %v378_v52  ;;  %v1519_v52 = vor.u32 %v1643_v50, %v1518_v49  ;;  %1018 = vmatpush.bf16.msra.mxu2 %v1503_v3  ;;  %v1571_v50 = vor.u32 %v1652_v47, %v1568_v48 }
  0xbf   :  { %v187_v8 = vpop.permute.xlu0 %186 }
  0xc0   :  { %v333_v9 = vsel %vm319_vm5, %v1849_v22, %v187_v8  ;;  %v222_v10 = vpop.permute.xlu1 %221  ;;  %v1479_v8 = vor.u32 %v1633_v5, %v1478_v55  ;;  %v1528_v55 = vld [vmem:[#allocation2 + $0x94] sm:$0xf0] }
  0xc1   :  { %v350_v11 = vsel %vm336_vm6, %v333_v9, %v222_v10  ;;  %v1631_v9 = vld [vmem:[#allocation2 + $0x2c] sm:$0xf]  ;;  %v1480_v10 = vld [vmem:[#allocation2 + $0x3c] sm:$0xf0] }
  0xc2   :  { %v367_v62 = vsel %vm353_vm7, %v350_v11, %v281_v12 }
  0xc7   :  { %v316_v13 = vpop.permute.xlu0 %315 }
  0xc8   :  { %v384_v14 = vsel %vm370_vm8, %v367_v62, %v316_v13  ;;  %v189_v15 = vpop.permute.xlu1 %188  ;;  %v1483_v62 = vor.u32 %v1631_v9, %v1480_v10 }
  0xc9   :  { %v335_v16 = vsel %vm319_vm5, %v1868_v39, %v189_v15  ;;  %v1578_v39 = vld [vmem:[#allocation2 + $0xf0] sm:$0xf]  ;;  %v1628_v15 = vld [vmem:[#allocation2 + $0x10] sm:$0xf0] }
  0xca   :  { %v352_v18 = vsel %vm336_vm6, %v335_v16, %v224_v17  ;;  %v1579_v31 = vor.u32 %v1658_v29, %v1578_v39  ;;  %1019 = vmatpush.bf16.msra.mxu2 %v1483_v62  ;;  %v1626_v16 = vld [vmem:[#allocation2 + $0x4] sm:$0xf]  ;;  %v1460_v17 = vld [vmem:[#allocation2 + $0x14] sm:$0xf0] }
  0xcb   :  { %1452 = vmatmul.msk.bf16.gmra.mxu0 %vm407_vm9, %v380_v60  ;;  %v1499_v60 = vor.u32 %v1638_v59, %v1498_v32  ;;  %v1548_v32 = vld [vmem:[#allocation2 + $0xbc] sm:$0xf0] }
  0xcc   :  { %985 = vmatpush.bf16.msra.mxu1 %v1579_v31  ;;  %1667 = vmatpush.bf16.msra.mxu3 %v1579_v31 }
  0xcf   :  { %v283_v19 = vpop.permute.xlu0 %282 }
  0xd0   :  { %v369_v22 = vsel %vm353_vm7, %v352_v18, %v283_v19  ;;  %v318_v20 = vpop.permute.xlu1 %317  ;;  %986 = vmatpush.bf16.msra.mxu1 %v1559_v37  ;;  %1668 = vmatpush.bf16.msra.mxu3 %v1559_v37 }
  0xd1   :  { %v386_v28 = vsel %vm370_vm8, %v369_v22, %v318_v20  ;;  %v1463_v22 = vor.u32 %v1626_v16, %v1460_v17  ;;  %v1488_v16 = vld [vmem:[#allocation2 + $0x44] sm:$0xf0] }
  0xd3   :  { %1020 = vmatpush.bf16.msra.mxu2 %v1463_v22 }
  0xd4   :  { %987 = vmatpush.bf16.msra.mxu1 %v1539_v1  ;;  %1669 = vmatpush.bf16.msra.mxu3 %v1539_v1  ;;  %v1591_v1 = vor.u32 %v1657_v41, %v1588_v42 }
  0xd8   :  { %988 = vmatpush.bf16.msra.mxu1 %v1519_v52  ;;  %1670 = vmatpush.bf16.msra.mxu3 %v1519_v52 }
  0xdb   :  { %1453 = vmatmul.msk.bf16.gmra.mxu0 %vm407_vm9, %v382_v7 }
  0xdc   :  { %989 = vmatpush.bf16.msra.mxu1 %v1499_v60  ;;  %1671 = vmatpush.bf16.msra.mxu3 %v1499_v60 }
  0xe0   :  { %990 = vmatpush.bf16.msra.mxu1 %v1479_v8  ;;  %1672 = vmatpush.bf16.msra.mxu3 %v1479_v8 }
  0xeb   :  { %1454 = vmatmul.msk.bf16.gmra.mxu0 %vm407_vm9, %v384_v14  ;;  %v1458_v14 = vld [vmem:[#allocation2] sm:$0xf] }
  0xec   :  { %v1459_v19 = vor.u32 %v1628_v15, %v1458_v14  ;;  %v1632_v15 = vld [vmem:[#allocation2 + $0x34] sm:$0xf] }
  0xee   :  { %991 = vmatpush.bf16.msra.mxu1 %v1459_v19  ;;  %1673 = vmatpush.bf16.msra.mxu3 %v1459_v19 }
  0xf2   :  { %1071 = vmatpush.bf16.msrb.mxu1 %v1611_v36 }
  0xf6   :  { %1072 = vmatpush.bf16.msrb.mxu1 %v1591_v1 }
  0xfa   :  { %1073 = vmatpush.bf16.msrb.mxu1 %v1571_v50 }
  0xfb   :  { %1455 = vmatmul.msk.bf16.gmra.mxu0 %vm407_vm9, %v386_v28 }
 0x108   :  { %v437_v51 = vpop.f32.mrf.mxu0 }
 0x109   :  { %v481_v54 = vadd.f32 %v1962_v45, %v437_v51 }
 0x10b   :  { %v497_v58 = vmax.f32 %v481_v54, 0.0 }
 0x10d   :  { %v516_v2 = vperm.slane %v497_v58, %v1965_v56  ;;  %v1647_v58 = vld [vmem:[#allocation2 + $0xac] sm:$0xf] }
 0x10e   :  { %v1551_v63 = vor.u32 %v1647_v58, %v1548_v32  ;;  %v1665_v58 = vld [vmem:[#allocation2 + $0x138] sm:$0xf0] }
 0x10f   :  { %v593_v4 = vrot.slane %v516_v2, 4 }
 0x110   :  { %v439_v7 = vpop.f32.mrf.mxu0  ;;  %1074 = vmatpush.bf16.msrb.mxu1 %v1551_v63  ;;  %v1606_v63 = vld [vmem:[#allocation2 + $0x120] sm:$0xf] }
 0x111   :  { %v625_v11 = vmax.f32 %v516_v2, %v593_v4  ;;  %v482_v12 = vadd.f32 %v1962_v45, %v439_v7  ;;  %v1642_v4 = vld [vmem:[#allocation2 + $0x84] sm:$0xf] }
 0x112   :  { %v1531_v7 = vor.u32 %v1642_v4, %v1528_v55 }
 0x113   :  { %657 = vst [vmem:[#allocation1] ss:$2 sm:$0xff] %v625_v11  ;;  %v498_v13 = vmax.f32 %v482_v12, 0.0  ;;  %v1637_v11 = vld [vmem:[#allocation2 + $0x5c] sm:$0xf] }
 0x114   :  { %1075 = vmatpush.bf16.msrb.mxu1 %v1531_v7  ;;  %v1508_v12 = vld [vmem:[#allocation2 + $0x6c] sm:$0xf0] }
 0x115   :  { %v520_v18 = vperm.slane %v498_v13, %v1965_v56  ;;  %v1511_v13 = vor.u32 %v1637_v11, %v1508_v12  ;;  %v1659_v11 = vld [vmem:[#allocation2 + $0x108] sm:$0xf0] }
 0x117   :  { %v594_v20 = vrot.slane %v520_v18, 4 }
 0x118   :  { %v442_v21 = vpop.f32.mrf.mxu0  ;;  %1076 = vmatpush.bf16.msrb.mxu1 %v1511_v13 }
 0x119   :  { %v626_v23 = vmax.f32 %v520_v18, %v594_v20  ;;  %v483_v24 = vadd.f32 %v1962_v45, %v442_v21  ;;  %v1491_v18 = vor.u32 %v1632_v15, %v1488_v16  ;;  %v1627_v21 = vld [vmem:[#allocation2 + $0xc] sm:$0xf]  ;;  %v1566_v16 = vld [vmem:[#allocation2 + $0xd0] sm:$0xf] }
 0x11a   :  { %v1655_v15 = vld [vmem:[#allocation2 + $0xe8] sm:$0xf0] }
 0x11b   :  { %659 = vst [vmem:[#allocation1 + $0x1] ss:$2 sm:$0xff] %v626_v23  ;;  %v499_v25 = vmax.f32 %v483_v24, 0.0  ;;  %v1468_v23 = vld [vmem:[#allocation2 + $0x1c] sm:$0xf0] }
 0x11c   :  { %1077 = vmatpush.bf16.msrb.mxu1 %v1491_v18  ;;  %v1654_v18 = vld [vmem:[#allocation2 + $0xe0] sm:$0xf0] }
 0x11d   :  { %v524_v26 = vperm.slane %v499_v25, %v1965_v56  ;;  %v1471_v25 = vor.u32 %v1627_v21, %v1468_v23  ;;  %v1546_v21 = vld [vmem:[#allocation2 + $0xa8] sm:$0xf]  ;;  %v1649_v23 = vld [vmem:[#allocation2 + $0xb8] sm:$0xf0] }
 0x11f   :  { %v595_v27 = vrot.slane %v524_v26, 4 }
 0x120   :  { %v444_v28 = vpop.f32.mrf.mxu0  ;;  %1078 = vmatpush.bf16.msrb.mxu1 %v1471_v25  ;;  %v1554_v25 = vld [vmem:[#allocation2 + $0xb0] sm:$0xf] }
 0x121   :  { %v627_v39 = vmax.f32 %v524_v26, %v595_v27  ;;  %v484_v29 = vadd.f32 %v1962_v45, %v444_v28 }
 0x122   :  { %v672_v44 = vld.sshfl [vmem:[#allocation1] sm:$0xff pattern:$0x75316420] }
 0x123   :  { %661 = vst [vmem:[#allocation1 + $0x10] ss:$2 sm:$0xff] %v627_v39  ;;  %v500_v30 = vmax.f32 %v484_v29, 0.0  ;;  %v696_v52 = vpack.c.bf16 %v672_v44, %v672_v44 }
 0x125   :  { %v528_v31 = vperm.slane %v500_v30, %v1965_v56  ;;  %v760_v60 = vunpack.c.l.b16 %v696_v52 }
 0x127   :  { %v596_v33 = vrot.slane %v528_v31, 4 }
 0x128   :  { %v447_v35 = vpop.f32.mrf.mxu0 }
 0x129   :  { %v628_v37 = vmax.f32 %v528_v31, %v596_v33  ;;  %v485_v38 = vadd.f32 %v1962_v45, %v447_v35 }
 0x12b   :  { %663 = vst [vmem:[#allocation1 + $0x11] ss:$2 sm:$0xff] %v628_v37  ;;  %v501_v40 = vmax.f32 %v485_v38, 0.0 }
 0x12d   :  { %v532_v43 = vperm.slane %v501_v40, %v1965_v56 }
 0x12f   :  { %v597_v46 = vrot.slane %v532_v43, 4 }
 0x130   :  { %v449_v49 = vpop.f32.mrf.mxu0 }
 0x131   :  { %v629_v6 = vmax.f32 %v532_v43, %v597_v46  ;;  %v486_v51 = vadd.f32 %v1962_v45, %v449_v49 }
 0x132   :  { %v673_v53 = vld.sshfl [vmem:[#allocation1 + $0x10] sm:$0xff pattern:$0x75316420] }
 0x133   :  { %665 = vst [vmem:[#allocation1 + $0x20] ss:$2 sm:$0xff] %v629_v6  ;;  %v502_v54 = vmax.f32 %v486_v51, 0.0  ;;  %v697_v57 = vpack.c.bf16 %v673_v53, %v673_v53 }
 0x135   :  { %v536_v59 = vperm.slane %v502_v54, %v1965_v56  ;;  %v761_v61 = vunpack.c.l.b16 %v697_v57  ;;  %v1614_v57 = vld [vmem:[#allocation2 + $0x128] sm:$0xf] }
 0x137   :  { %v598_v2 = vrot.slane %v536_v59, 4  ;;  %v1978_v3 = vpack.c.b16 %v761_v61, %v760_v60 }
 0x138   :  { %v452_v5 = vpop.f32.mrf.mxu0 }
 0x139   :  { %v630_v8 = vmax.f32 %v536_v59, %v598_v2  ;;  %v487_v9 = vadd.f32 %v1962_v45, %v452_v5  ;;  %992 = vmatmul.bf16.vlgmr.msra.gmra.mxu1 %v1978_v3  ;;  %1021 = vmatmul.bf16.vlgmr.msra.gmra.mxu2 %v1978_v3  ;;  %v1615_v59 = vor.u32 %v1665_v58, %v1614_v57  ;;  %v1664_v2 = vld [vmem:[#allocation2 + $0x130] sm:$0xf0]  ;;  %v1486_v58 = vld [vmem:[#allocation2 + $0x30] sm:$0xf] }
 0x13a   :  { %v1607_v5 = vor.u32 %v1664_v2, %v1606_v63 }
 0x13b   :  { %667 = vst [vmem:[#allocation1 + $0x21] ss:$2 sm:$0xff] %v630_v8  ;;  %v503_v10 = vmax.f32 %v487_v9, 0.0  ;;  %1674 = vmatpush.bf16.msrb.mxu2 %v1615_v59  ;;  %1100 = vmatpush.bf16.msra.mxu1 %v1615_v59  ;;  %v1594_v8 = vld [vmem:[#allocation2 + $0x100] sm:$0xf] }
 0x13c   :  { %1042 = vmatpush.bf16.msrb.mxu3 %v1607_v5  ;;  %v1660_v9 = vld [vmem:[#allocation2 + $0x110] sm:$0xf0]  ;;  %v1466_v5 = vld [vmem:[#allocation2 + $0x8] sm:$0xf] }
 0x13d   :  { %v540_v62 = vperm.slane %v503_v10, %v1965_v56  ;;  %v1586_v10 = vld [vmem:[#allocation2 + $0xf8] sm:$0xf] }
 0x13e   :  { %v1587_v13 = vor.u32 %v1659_v11, %v1586_v10  ;;  %v1474_v10 = vld [vmem:[#allocation2 + $0x10] sm:$0xf]  ;;  %v1630_v11 = vld [vmem:[#allocation2 + $0x20] sm:$0xf0] }
 0x13f   :  { %v599_v14 = vrot.slane %v540_v62, 4 }
 0x140   :  { %v454_v17 = vpop.f32.mrf.mxu0  ;;  %1043 = vmatpush.bf16.msrb.mxu3 %v1587_v13  ;;  %v1475_v13 = vor.u32 %v1630_v11, %v1474_v10 }
 0x141   :  { %v631_v19 = vmax.f32 %v540_v62, %v599_v14  ;;  %v488_v22 = vadd.f32 %v1962_v45, %v454_v17  ;;  %v1595_v62 = vor.u32 %v1660_v9, %v1594_v8  ;;  %v1574_v14 = vld [vmem:[#allocation2 + $0xd8] sm:$0xf] }
 0x142   :  { %v674_v31 = vld.sshfl [vmem:[#allocation1 + $0x20] sm:$0xff pattern:$0x75316420] }
 0x143   :  { %669 = vst [vmem:[#allocation1 + $0x30] ss:$2 sm:$0xff] %v631_v19  ;;  %v504_v20 = vmax.f32 %v488_v22, 0.0  ;;  %v698_v36 = vpack.c.bf16 %v674_v31, %v674_v31  ;;  %1675 = vmatpush.bf16.msrb.mxu2 %v1595_v62  ;;  %v1575_v22 = vor.u32 %v1655_v15, %v1574_v14  ;;  %1101 = vmatpush.bf16.msra.mxu1 %v1595_v62 }
 0x145   :  { %v544_v24 = vperm.slane %v504_v20, %v1965_v56  ;;  %v762_v42 = vunpack.c.l.b16 %v698_v36  ;;  %v1567_v20 = vor.u32 %v1654_v18, %v1566_v16 }
 0x147   :  { %v600_v26 = vrot.slane %v544_v24, 4  ;;  %1676 = vmatpush.bf16.msrb.mxu2 %v1575_v22  ;;  %1044 = vmatpush.bf16.msrb.mxu3 %v1567_v20 }
 0x148   :  { %v457_v27 = vpop.f32.mrf.mxu0  ;;  %1102 = vmatpush.bf16.msra.mxu1 %v1575_v22 }
 0x149   :  { %v632_v28 = vmax.f32 %v544_v24, %v600_v26  ;;  %v489_v39 = vadd.f32 %v1962_v45, %v457_v27  ;;  %v1650_v26 = vld [vmem:[#allocation2 + $0xc0] sm:$0xf0] }
 0x14b   :  { %671 = vst [vmem:[#allocation1 + $0x31] ss:$2 sm:$0xff] %v632_v28  ;;  %v505_v29 = vmax.f32 %v489_v39, 0.0 }
 0x14d   :  { %v548_v30 = vperm.slane %v505_v29, %v1965_v56 }
 0x14f   :  { %v601_v33 = vrot.slane %v548_v30, 4 }
 0x150   :  { %v459_v34 = vpop.f32.mrf.mxu0 }
 0x151   :  { %v633_v0 = vmax.f32 %v548_v30, %v601_v33  ;;  %v490_v35 = vadd.f32 %v1962_v45, %v459_v34  ;;  %v1547_v30 = vor.u32 %v1649_v23, %v1546_v21  ;;  %v1555_v34 = vor.u32 %v1650_v26, %v1554_v25 }
 0x152   :  { %v675_v37 = vld.sshfl [vmem:[#allocation1 + $0x30] sm:$0xff pattern:$0x75316420] }
 0x153   :  { %676 = vst [vmem:[#allocation1] ss:$2 sm:$0xff] %v633_v0  ;;  %v506_v38 = vmax.f32 %v490_v35, 0.0  ;;  %v699_v40 = vpack.c.bf16 %v675_v37, %v675_v37  ;;  %1045 = vmatpush.bf16.msrb.mxu3 %v1547_v30  ;;  %1677 = vmatpush.bf16.msrb.mxu2 %v1555_v34 }
 0x154   :  { %1103 = vmatpush.bf16.msra.mxu1 %v1555_v34 }
 0x155   :  { %v552_v41 = vperm.slane %v506_v38, %v1965_v56  ;;  %v763_v43 = vunpack.c.l.b16 %v699_v40 }
 0x157   :  { %v602_v1 = vrot.slane %v552_v41, 4  ;;  %v1990_v44 = vpack.c.b16 %v763_v43, %v762_v42  ;;  %v1644_v42 = vld [vmem:[#allocation2 + $0x90] sm:$0xf0]  ;;  %v1534_v43 = vld [vmem:[#allocation2 + $0x88] sm:$0xf] }
 0x158   :  { %v462_v46 = vpop.f32.mrf.mxu0 }
 0x159   :  { %v634_v47 = vmax.f32 %v552_v41, %v602_v1  ;;  %v491_v48 = vadd.f32 %v1962_v45, %v462_v46  ;;  %997 = vmatmul.bf16.gmra.mxu1 %v1990_v44  ;;  %1026 = vmatmul.bf16.gmra.mxu2 %v1990_v44  ;;  %v1526_v41 = vld [vmem:[#allocation2 + $0x80] sm:$0xf] }
 0x15b   :  { %677 = vst [vmem:[#allocation1 + $0x1] ss:$2 sm:$0xff] %v634_v47  ;;  %v507_v49 = vmax.f32 %v491_v48, 0.0  ;;  %v1527_v47 = vor.u32 %v1644_v42, %v1526_v41  ;;  %v1645_v48 = vld [vmem:[#allocation2 + $0x98] sm:$0xf0] }
 0x15d   :  { %v556_v50 = vperm.slane %v507_v49, %v1965_v56  ;;  %v1535_v49 = vor.u32 %v1645_v48, %v1534_v43  ;;  %1046 = vmatpush.bf16.msrb.mxu3 %v1527_v47 }
 0x15f   :  { %v603_v6 = vrot.slane %v556_v50, 4  ;;  %1104 = vmatpush.bf16.msra.mxu1 %v1535_v49  ;;  %1678 = vmatpush.bf16.msrb.mxu2 %v1535_v49 }
 0x160   :  { %v464_v51 = vpop.f32.mrf.mxu0 }
 0x161   :  { %v635_v52 = vmax.f32 %v556_v50, %v603_v6  ;;  %v492_v53 = vadd.f32 %v1962_v45, %v464_v51  ;;  %v1506_v50 = vld [vmem:[#allocation2 + $0x58] sm:$0xf]  ;;  %v1639_v6 = vld [vmem:[#allocation2 + $0x68] sm:$0xf0]  ;;  %v1514_v51 = vld [vmem:[#allocation2 + $0x60] sm:$0xf] }
 0x162   :  { %v684_v17 = vld.sshfl [vmem:[#allocation1] sm:$0xff pattern:$0x75316420] }
 0x163   :  { %678 = vst [vmem:[#allocation1 + $0x10] ss:$2 sm:$0xff] %v635_v52  ;;  %v508_v54 = vmax.f32 %v492_v53, 0.0  ;;  %v700_v39 = vpack.c.bf16 %v684_v17, %v684_v17  ;;  %v1507_v53 = vor.u32 %v1639_v6, %v1506_v50 }
 0x165   :  { %v560_v32 = vperm.slane %v508_v54, %v1965_v56  ;;  %v764_v35 = vunpack.c.l.b16 %v700_v39  ;;  %v1640_v54 = vld [vmem:[#allocation2 + $0x70] sm:$0xf0]  ;;  %1047 = vmatpush.bf16.msrb.mxu3 %v1507_v53 }
 0x166   :  { %v1515_v57 = vor.u32 %v1640_v54, %v1514_v51 }
 0x167   :  { %v604_v60 = vrot.slane %v560_v32, 4 }
 0x168   :  { %v467_v61 = vpop.f32.mrf.mxu0  ;;  %1105 = vmatpush.bf16.msra.mxu1 %v1515_v57  ;;  %1679 = vmatpush.bf16.msrb.mxu2 %v1515_v57 }
 0x169   :  { %v636_v4 = vmax.f32 %v560_v32, %v604_v60  ;;  %v493_v55 = vadd.f32 %v1962_v45, %v467_v61  ;;  %1079 = vmatmul.bf16.vlgmr.msrb.gmra.mxu1 %v1978_v3  ;;  %v1634_v32 = vld [vmem:[#allocation2 + $0x40] sm:$0xf0]  ;;  %v1494_v60 = vld [vmem:[#allocation2 + $0x38] sm:$0xf]  ;;  %v1635_v61 = vld [vmem:[#allocation2 + $0x48] sm:$0xf0] }
 0x16a   :  { %v1487_v2 = vor.u32 %v1634_v32, %v1486_v58 }
 0x16b   :  { %679 = vst [vmem:[#allocation1 + $0x11] ss:$2 sm:$0xff] %v636_v4  ;;  %v509_v7 = vmax.f32 %v493_v55, 0.0  ;;  %v1495_v55 = vor.u32 %v1635_v61, %v1494_v60 }
 0x16c   :  { %1048 = vmatpush.bf16.msrb.mxu3 %v1487_v2 }
 0x16d   :  { %v564_v12 = vperm.slane %v509_v7, %v1965_v56  ;;  %v1629_v7 = vld [vmem:[#allocation2 + $0x18] sm:$0xf0]  ;;  %1106 = vmatpush.bf16.msra.mxu1 %v1495_v55  ;;  %1680 = vmatpush.bf16.msrb.mxu2 %v1495_v55 }
 0x16e   :  { %v1467_v62 = vor.u32 %v1629_v7, %v1466_v5  ;;  %v2057_v5 = vld [vmem:[%s2128_s4] ss:$0 sm:$0xff] }
 0x16f   :  { %v605_v19 = vrot.slane %v564_v12, 4 }
 0x170   :  { %v469_v24 = vpop.f32.mrf.mxu0  ;;  %1049 = vmatpush.bf16.msrb.mxu3 %v1467_v62 }
 0x171   :  { %v637_v27 = vmax.f32 %v564_v12, %v605_v19  ;;  %v494_v28 = vadd.f32 %v1962_v45, %v469_v24  ;;  %1107 = vmatpush.bf16.msra.mxu1 %v1475_v13  ;;  %1681 = vmatpush.bf16.msrb.mxu2 %v1475_v13 }
 0x172   :  { %v685_v29 = vld.sshfl [vmem:[#allocation1 + $0x10] sm:$0xff pattern:$0x75316420] }
 0x173   :  { %680 = vst [vmem:[#allocation1 + $0x20] ss:$2 sm:$0xff] %v637_v27  ;;  %v510_v31 = vmax.f32 %v494_v28, 0.0  ;;  %v701_v33 = vpack.c.bf16 %v685_v29, %v685_v29 }
 0x175   :  { %v568_v0 = vperm.slane %v510_v31, %v1965_v56  ;;  %v765_v36 = vunpack.c.l.b16 %v701_v33 }
 0x177   :  { %v606_v37 = vrot.slane %v568_v0, 4  ;;  %v2003_v38 = vpack.c.b16 %v765_v36, %v764_v35 }
 0x178   :  { %v472_v40 = vpop.f32.mrf.mxu0 }
 0x179   :  { %v638_v1 = vmax.f32 %v568_v0, %v606_v37  ;;  %v495_v46 = vadd.f32 %v1962_v45, %v472_v40  ;;  %1002 = vmatmul.bf16.vlgmr.msra.gmra.mxu3 %v2003_v38  ;;  %1031 = vmatmul.bf16.gmra.mxu2 %v2003_v38 }
 0x17a   :  { %1084 = vmatmul.bf16.gmra.mxu1 %v1990_v44 }
 0x17b   :  { %681 = vst [vmem:[#allocation1 + $0x21] ss:$2 sm:$0xff] %v638_v1  ;;  %v511_v52 = vmax.f32 %v495_v46, 0.0 }
 0x17d   :  { %v572_v59 = vperm.slane %v511_v52, %v1965_v56 }
 0x17f   :  { %v607_v63 = vrot.slane %v572_v59, 4 }
 0x180   :  { %v474_v4 = vpop.f32.mrf.mxu0 }
 0x181   :  { %v639_v8 = vmax.f32 %v572_v59, %v607_v63  ;;  %v496_v9 = vadd.f32 %v1962_v45, %v474_v4 }
 0x182   :  { %v686_v45 = vld.sshfl [vmem:[#allocation1 + $0x20] sm:$0xff pattern:$0x75316420] }
 0x183   :  { %682 = vst [vmem:[#allocation1 + $0x30] ss:$2 sm:$0xff] %v639_v8  ;;  %v512_v12 = vmax.f32 %v496_v9, 0.0  ;;  %v702_v17 = vpack.c.bf16 %v686_v45, %v686_v45 }
 0x185   :  { %v576_v14 = vperm.slane %v512_v12, %v1965_v56  ;;  %v766_v22 = vunpack.c.l.b16 %v702_v17 }
 0x187   :  { %v608_v15 = vrot.slane %v576_v14, 4 }
 0x189   :  { %v640_v16 = vmax.f32 %v576_v14, %v608_v15 }
 0x18a   :  { %1089 = vmatmul.bf16.gmra.mxu1 %v2003_v38 }
 0x18b   :  { %683 = vst [vmem:[#allocation1 + $0x31] ss:$2 sm:$0xff] %v640_v16 }
 0x192   :  { %v687_v18 = vld.sshfl [vmem:[#allocation1 + $0x30] sm:$0xff pattern:$0x75316420] }
 0x193   :  { %v703_v19 = vpack.c.bf16 %v687_v18, %v687_v18 }
 0x195   :  { %v767_v20 = vunpack.c.l.b16 %v703_v19 }
 0x197   :  { %v771_v21 = vpack.c.b16 %v767_v20, %v766_v22 }
 0x199   :  { %1007 = vmatmul.bf16.gmra.mxu3 %v771_v21  ;;  %1036 = vmatmul.bf16.gmra.mxu2 %v771_v21 }
 0x19a   :  { %1094 = vmatmul.bf16.gmra.mxu1 %v771_v21 }
 0x1a9   :  { %1050 = vmatmul.bf16.vlgmr.msrb.gmra.mxu3 %v1978_v3  ;;  %1113 = vmatmul.bf16.vlgmr.msrb.gmra.mxu2 %v1990_v44 }
 0x1aa   :  { %1108 = vmatmul.bf16.vlgmr.msra.gmra.mxu1 %v1978_v3 }
 0x1b6   :  { %v993_v23 = vpop.f32.mrf.mxu1 }
 0x1b9   :  { %1055 = vmatmul.bf16.gmra.mxu3 %v1990_v44  ;;  %1118 = vmatmul.bf16.gmra.mxu2 %v2003_v38 }
 0x1bc   :  { %v1022_v28 = vpop.f32.mrf.mxu2 }
 0x1bd   :  { %v1138_v49 = vrot.slane %v1022_v28, 1 }
 0x1be   :  { %v995_v24 = vpop.f32.mrf.mxu1 }
 0x1c4   :  { %v1024_v29 = vpop.f32.mrf.mxu2 }
 0x1c5   :  { %v1139_v48 = vrot.slane %v1024_v29, 1 }
 0x1c7   :  { %v1140_v6 = vsel %vm190_vm2, %v1138_v49, %v1139_v48 }
 0x1c8   :  { %v1160_v58 = vadd.f32 %v1140_v6, %v993_v23 }
 0x1c9   :  { %1060 = vmatmul.bf16.gmra.mxu3 %v2003_v38  ;;  %1123 = vmatmul.bf16.gmra.mxu2 %v771_v21 }
 0x1d6   :  { %v2019_v25 = vpop.f32.mrf.mxu1 }
 0x1d9   :  { %1065 = vmatmul.bf16.gmra.mxu3 %v771_v21 }
 0x1dc   :  { %v1027_v3 = vpop.f32.mrf.mxu2 }
 0x1dd   :  { %v1141_v32 = vrot.slane %v1027_v3, 1 }
 0x1de   :  { %v2021_v26 = vpop.f32.mrf.mxu1 }
 0x1df   :  { %v1142_v7 = vsel %vm190_vm2, %v1139_v48, %v1141_v32 }
 0x1e0   :  { %v1161_v13 = vadd.f32 %v1142_v7, %v995_v24 }
 0x1e4   :  { %v1029_v31 = vpop.f32.mrf.mxu2 }
 0x1e5   :  { %v1143_v15 = vrot.slane %v1029_v31, 1 }
 0x1e6   :  { %v1080_v27 = vpop.f32.mrf.mxu1 }
 0x1e7   :  { %v1216_v59 = vrot.slane %v1080_v27, 3  ;;  %v1144_v21 = vsel %vm190_vm2, %v1141_v32, %v1143_v15 }
 0x1e8   :  { %v1162_v3 = vadd.f32 %v1144_v21, %v2019_v25 }
 0x1ee   :  { %v1082_v39 = vpop.f32.mrf.mxu1 }
 0x1ef   :  { %v1217_v53 = vrot.slane %v1082_v39, 3  ;;  %v1163_v39 = vadd.f32 %v1143_v15, %v2021_v26 }
 0x1f1   :  { %v1218_v2 = vsel %vm1215_vm10, %v1216_v59, %v1217_v53 }
 0x1f7   :  { %v2023_v30 = vpop.f32.mrf.mxu1 }
 0x1f8   :  { %v1219_v12 = vrot.slane %v2023_v30, 3 }
 0x1fa   :  { %v1220_v18 = vsel %vm1215_vm10, %v1217_v53, %v1219_v12 }
 0x1fc   :  { %v2029_v34 = vpop.f32.mrf.mxu3  ;;  %v2031_v0 = vpop.f32.mrf.mxu2 }
 0x1fd   :  { %v1145_v7 = vrot.slane %v2031_v0, 1 }
 0x1ff   :  { %v2025_v44 = vpop.f32.mrf.mxu1 }
 0x200   :  { %v1221_v29 = vrot.slane %v2025_v44, 3 }
 0x204   :  { %v2035_v36 = vpop.f32.mrf.mxu3  ;;  %v2037_v37 = vpop.f32.mrf.mxu2 }
 0x207   :  { %v2027_v33 = vpop.f32.mrf.mxu1 }
 0x20f   :  { %v2033_v35 = vpop.f32.mrf.mxu1 }
 0x217   :  { %v2039_v38 = vpop.f32.mrf.mxu1 }
 0x21c   :  { %v2041_v40 = vpop.f32.mrf.mxu3  ;;  %v2043_v41 = vpop.f32.mrf.mxu2 }
 0x21d   :  { %v1148_v0 = vrot.slane %v2043_v41, 1 }
 0x21f   :  { %v2045_v42 = vpop.f32.mrf.mxu1 }
 0x224   :  { %v2047_v43 = vpop.f32.mrf.mxu3  ;;  %v2049_v1 = vpop.f32.mrf.mxu2 }
 0x227   :  { %v1109_v46 = vpop.f32.mrf.mxu1 }
 0x228   :  { %v1254_v4 = vrot.slane %v1109_v46, 4 }
 0x22c   :  { %v1051_v47 = vpop.f32.mrf.mxu3  ;;  %v1114_v50 = vpop.f32.mrf.mxu2 }
 0x22d   :  { %v1177_v54 = vrot.slane %v1051_v47, 2  ;;  %v1257_v19 = vrot.slane %v1114_v50, 4 }
 0x22f   :  { %v1111_v51 = vpop.f32.mrf.mxu1 }
 0x230   :  { %v1255_v60 = vrot.slane %v1111_v51, 4 }
 0x232   :  { %v1256_v8 = vsel %vm424_vm4, %v1254_v4, %v1255_v60  ;;  %v1258_v23 = vsel %vm424_vm4, %v1255_v60, %v1257_v19 }
 0x234   :  { %v1053_v52 = vpop.f32.mrf.mxu3  ;;  %v1116_v10 = vpop.f32.mrf.mxu2 }
 0x235   :  { %v1178_v57 = vrot.slane %v1053_v52, 2  ;;  %v1259_v48 = vrot.slane %v1116_v10, 4  ;;  %v1222_v52 = vsel %vm1215_vm10, %v1219_v12, %v1221_v29 }
 0x237   :  { %v1179_v61 = vsel %vm284_vm3, %v1177_v54, %v1178_v57  ;;  %v1260_v54 = vsel %vm424_vm4, %v1257_v19, %v1259_v48 }
 0x238   :  { %v1199_v63 = vadd.f32 %v1179_v61, %v1160_v58 }
 0x23a   :  { %v1238_v55 = vadd.f32 %v1218_v2, %v1199_v63  ;;  %v1146_v63 = vrot.slane %v2037_v37, 1 }
 0x23c   :  { %v1276_v9 = vadd.f32 %v1256_v8, %v1238_v55  ;;  %v1056_v11 = vpop.f32.mrf.mxu3  ;;  %v1119_v47 = vpop.f32.mrf.mxu2  ;;  %v1147_v10 = vsel %vm190_vm2, %v1145_v7, %v1146_v63 }
 0x23d   :  { %v1180_v62 = vrot.slane %v1056_v11, 2  ;;  %v1261_v21 = vrot.slane %v1119_v47, 4 }
 0x23e   :  { %v1288_v14 = vadd.f32 %v2057_v5, %v1276_v9 }
 0x23f   :  { %v1181_v16 = vsel %vm284_vm3, %v1178_v57, %v1180_v62 }
 0x240   :  { %v1296_v45 = vmax.f32 %v1288_v14, 0.0  ;;  %v1200_v17 = vadd.f32 %v1181_v16, %v1161_v13  ;;  %v1224_v13 = vrot.slane %v2033_v35, 3  ;;  %v1164_v16 = vadd.f32 %v1147_v10, %v2029_v34 }
 0x242   :  { %v1307_v22 = vperm.slane %v1296_v45, %v1965_v56  ;;  %v1239_v20 = vadd.f32 %v1220_v18, %v1200_v17  ;;  %v1223_v45 = vrot.slane %v2027_v33, 3  ;;  %v1149_v33 = vsel %vm190_vm2, %v1146_v63, %v1148_v0 }
 0x244   :  { %v1344_v27 = vrot.slane %v1307_v22, 4  ;;  %v1277_v28 = vadd.f32 %v1258_v23, %v1239_v20  ;;  %v1058_v24 = vpop.f32.mrf.mxu3  ;;  %v1121_v55 = vpop.f32.mrf.mxu2  ;;  %v1225_v20 = vsel %vm1215_vm10, %v1223_v45, %v1224_v13 }
 0x245   :  { %v1182_v30 = vrot.slane %v1058_v24, 2  ;;  %v1262_v19 = vrot.slane %v1121_v55, 4  ;;  %v1226_v24 = vrot.slane %v2039_v38, 3 }
 0x246   :  { %v1360_v31 = vmax.f32 %v1307_v22, %v1344_v27  ;;  %v1289_v46 = vadd.f32 %v2057_v5, %v1277_v28 }
 0x247   :  { %v1183_v49 = vsel %vm284_vm3, %v1180_v62, %v1182_v30  ;;  %v1202_v50 = vadd.f32 %v1182_v30, %v1163_v39  ;;  %v1263_v41 = vsel %vm424_vm4, %v1261_v21, %v1262_v19 }
 0x248   :  { %1376 = vst [vmem:[#allocation1] ss:$2 sm:$0xff] %v1360_v31  ;;  %v1297_v6 = vmax.f32 %v1289_v46, 0.0  ;;  %v1201_v51 = vadd.f32 %v1183_v49, %v1162_v3  ;;  %v1150_v3 = vrot.slane %v2049_v1, 1 }
 0x249   :  { %v1241_v53 = vadd.f32 %v1221_v29, %v1202_v50  ;;  %v1165_v29 = vadd.f32 %v1149_v33, %v2035_v36  ;;  %v1227_v50 = vsel %vm1215_vm10, %v1224_v13, %v1226_v24 }
 0x24a   :  { %v1311_v26 = vperm.slane %v1297_v6, %v1965_v56  ;;  %v1240_v44 = vadd.f32 %v1222_v52, %v1201_v51  ;;  %v1151_v36 = vsel %vm190_vm2, %v1148_v0, %v1150_v3 }
 0x24b   :  { %v1279_v25 = vadd.f32 %v1259_v48, %v1241_v53 }
 0x24c   :  { %v1345_v57 = vrot.slane %v1311_v26, 4  ;;  %v1278_v58 = vadd.f32 %v1260_v54, %v1240_v44  ;;  %v1061_v32 = vpop.f32.mrf.mxu3  ;;  %v1124_v34 = vpop.f32.mrf.mxu2  ;;  %v1228_v44 = vrot.slane %v2045_v42, 3  ;;  %v1167_v54 = vadd.f32 %v1150_v3, %v2047_v43 }
 0x24d   :  { %v1291_v59 = vadd.f32 %v2057_v5, %v1279_v25  ;;  %v1184_v15 = vrot.slane %v1061_v32, 2  ;;  %v1264_v31 = vrot.slane %v1124_v34, 4 }
 0x24e   :  { %v1361_v60 = vmax.f32 %v1311_v26, %v1345_v57  ;;  %v1290_v61 = vadd.f32 %v2057_v5, %v1278_v58  ;;  %v1166_v57 = vadd.f32 %v1151_v36, %v2041_v40 }
 0x24f   :  { %v1299_v2 = vmax.f32 %v1291_v59, 0.0  ;;  %v1265_v51 = vsel %vm424_vm4, %v1262_v19, %v1264_v31 }
 0x250   :  { %1378 = vst [vmem:[#allocation1 + $0x1] ss:$2 sm:$0xff] %v1361_v60  ;;  %v1298_v4 = vmax.f32 %v1290_v61, 0.0 }
 0x251   :  { %v1319_v8 = vperm.slane %v1299_v2, %v1965_v56 }
 0x252   :  { %v1315_v9 = vperm.slane %v1298_v4, %v1965_v56  ;;  %v1229_v4 = vsel %vm1215_vm10, %v1226_v24, %v1228_v44 }
 0x253   :  { %v1347_v11 = vrot.slane %v1319_v8, 4 }
 0x254   :  { %v1346_v12 = vrot.slane %v1315_v9, 4  ;;  %v1063_v62 = vpop.f32.mrf.mxu3  ;;  %v1126_v52 = vpop.f32.mrf.mxu2 }
 0x255   :  { %v1363_v14 = vmax.f32 %v1319_v8, %v1347_v11  ;;  %v1185_v37 = vrot.slane %v1063_v62, 2  ;;  %v1266_v59 = vrot.slane %v1126_v52, 4 }
 0x256   :  { %v1362_v17 = vmax.f32 %v1315_v9, %v1346_v12 }
 0x257   :  { %v1383_v18 = vld.sshfl [vmem:[#allocation1] sm:$0xff pattern:$0x75316420]  ;;  %1382 = vst [vmem:[#allocation1 + $0x11] ss:$2 sm:$0xff] %v1363_v14  ;;  %v1186_v22 = vsel %vm284_vm3, %v1184_v15, %v1185_v37  ;;  %v1267_v43 = vsel %vm424_vm4, %v1264_v31, %v1266_v59 }
 0x258   :  { %1399 = vst [vmem:[%s2129_s5] sm:$0xff] %v1383_v18  ;;  %v1203_v35 = vadd.f32 %v1186_v22, %v1164_v16 }
 0x259   :  { %1380 = vst [vmem:[#allocation1 + $0x10] ss:$2 sm:$0xff] %v1362_v17 }
 0x25a   :  { %v1242_v23 = vadd.f32 %v1225_v20, %v1203_v35 }
 0x25c   :  { %v1280_v27 = vadd.f32 %v1263_v41, %v1242_v23  ;;  %v1066_v28 = vpop.f32.mrf.mxu3 }
 0x25d   :  { %v1187_v39 = vrot.slane %v1066_v28, 2 }
 0x25e   :  { %v1292_v30 = vadd.f32 %v2057_v5, %v1280_v27 }
 0x25f   :  { %v1188_v46 = vsel %vm284_vm3, %v1185_v37, %v1187_v39 }
 0x260   :  { %v1384_v47 = vld.sshfl [vmem:[#allocation1 + $0x10] sm:$0xff pattern:$0x75316420]  ;;  %v1300_v48 = vmax.f32 %v1292_v30, 0.0  ;;  %v1204_v49 = vadd.f32 %v1188_v46, %v1165_v29 }
 0x261   :  { %1400 = vst [vmem:[%s2129_s5 + $0x8] sm:$0x1f] %v1384_v47 }
 0x262   :  { %v1323_v38 = vperm.slane %v1300_v48, %v1965_v56  ;;  %v1243_v6 = vadd.f32 %v1227_v50, %v1204_v49 }
 0x264   :  { %v1348_v1 = vrot.slane %v1323_v38, 4  ;;  %v1281_v53 = vadd.f32 %v1265_v51, %v1243_v6  ;;  %v1068_v26 = vpop.f32.mrf.mxu3 }
 0x265   :  { %v1189_v25 = vrot.slane %v1068_v26, 2 }
 0x266   :  { %v1364_v58 = vmax.f32 %v1323_v38, %v1348_v1  ;;  %v1293_v32 = vadd.f32 %v2057_v5, %v1281_v53 }
 0x267   :  { %v1190_v60 = vsel %vm284_vm3, %v1187_v39, %v1189_v25  ;;  %v1206_v61 = vadd.f32 %v1189_v25, %v1167_v54 }
 0x268   :  { %1386 = vst [vmem:[#allocation1 + $0x20] ss:$2 sm:$0xff] %v1364_v58  ;;  %v1301_v63 = vmax.f32 %v1293_v32, 0.0  ;;  %v1205_v2 = vadd.f32 %v1190_v60, %v1166_v57 }
 0x269   :  { %v1245_v55 = vadd.f32 %v1228_v44, %v1206_v61 }
 0x26a   :  { %v1327_v42 = vperm.slane %v1301_v63, %v1965_v56  ;;  %v1244_v7 = vadd.f32 %v1229_v4, %v1205_v2 }
 0x26b   :  { %v1283_v8 = vadd.f32 %v1266_v59, %v1245_v55 }
 0x26c   :  { %v1349_v40 = vrot.slane %v1327_v42, 4  ;;  %v1282_v9 = vadd.f32 %v1267_v43, %v1244_v7 }
 0x26d   :  { %v1295_v10 = vadd.f32 %v2057_v5, %v1283_v8 }
 0x26e   :  { %v1365_v11 = vmax.f32 %v1327_v42, %v1349_v40  ;;  %v1294_v12 = vadd.f32 %v2057_v5, %v1282_v9 }
 0x26f   :  { %v1303_v62 = vmax.f32 %v1295_v10, 0.0 }
 0x270   :  { %1388 = vst [vmem:[#allocation1 + $0x21] ss:$2 sm:$0xff] %v1365_v11  ;;  %v1302_v13 = vmax.f32 %v1294_v12, 0.0 }
 0x271   :  { %v1335_v14 = vperm.slane %v1303_v62, %v1965_v56 }
 0x272   :  { %v1331_v15 = vperm.slane %v1302_v13, %v1965_v56 }
 0x273   :  { %v1351_v37 = vrot.slane %v1335_v14, 4 }
 0x274   :  { %v1350_v16 = vrot.slane %v1331_v15, 4 }
 0x275   :  { %v1367_v45 = vmax.f32 %v1335_v14, %v1351_v37 }
 0x276   :  { %v1366_v0 = vmax.f32 %v1331_v15, %v1350_v16 }
 0x277   :  { %v1393_v17 = vld.sshfl [vmem:[#allocation1 + $0x20] sm:$0xff pattern:$0x75316420]  ;;  %1392 = vst [vmem:[#allocation1 + $0x31] ss:$2 sm:$0xff] %v1367_v45 }
 0x278   :  { %1401 = vst [vmem:[%s2129_s5 + $0x10] sm:$0xff] %v1393_v17 }
 0x279   :  { %1390 = vst [vmem:[#allocation1 + $0x30] ss:$2 sm:$0xff] %v1366_v0 }
 0x280   :  { %v1394_v18 = vld.sshfl [vmem:[#allocation1 + $0x30] sm:$0xff pattern:$0x75316420] }
 0x281   :  { %1402 = vst [vmem:[%s2129_s5 + $0x18] sm:$0x1f] %v1394_v18 }
 0x282   :  { %1407 = vsyncpa [#allocation3], 1 }

// kernel: tpu_custom_call.1
= control target key start
LH: loop header
LB: loop body
LE: loop exit
PB: predicated region body
PF: predicated region fallthrough
CT: control target
= control target key end

     0   :  { %10 = vsyncpa [#allocation3], 0  ;;  %s1718_s21 = smov [#allocation2]   ;;  %s1719_s23 = smov 320   ;;  %s2124_s0 = inlined_call_operand.vmem [shape: bf16[2,68,8], index: 0, kind: input, shape index: {}]   ;;  %s2125_s1 = inlined_call_operand.vmem [shape: bf16[40,128], index: 1, kind: input, shape index: {}]   ;;  %s2126_s2 = inlined_call_operand.vmem [shape: f32[1,128], index: 2, kind: input, shape index: {}]   ;;  %s2127_s3 = inlined_call_operand.hbm [shape: bf16[128,640], index: 3, kind: input, shape index: {}]   ;;  %s2128_s4 = inlined_call_operand.vmem [shape: f32[1,128], index: 4, kind: input, shape index: {}]   ;;  %s2129_s5 = inlined_call_operand.vmem [shape: f32[2,13,128], index: 5, kind: output, shape index: {}]  }
   0x1   :  { %s21_s20 = sshll.u32 %s2127_s3, 4  ;;  %s23_s22 = sshll.u32 %s1718_s21, 4  ;;  %s22_s20 = int_to_ptr.hbm [resolvable:$true] %s21_s20  ;;  %s24_s22 = int_to_ptr.vmem [resolvable:$true] %s23_s22 }
   0x2   :  { %s1720_s24 = smov 20  }
   0x3   :  { %29 = dma.hbm_to_vmem [thread:$0]  %s22_s20, 5120, %s24_s22, [#allocation3], %s1719_s23, %s1719_s23, %s1720_s24  }
   0x4   :  { %1716 = dma.done.wait [#allocation3], 5120  }
   0x5   :  { %1717 = vsyncadd [#allocation3], 4294962176  ;;  %v1762_v0 = vld [vmem:[%s2124_s0] sm:$0xff]  ;;  %v1767_v1 = vld [vmem:[%s2124_s0 + $0x8] sm:$0xff]  ;;  %vm101_vm0 = vsmask.f32 7424 }
   0x6   :  { %v103_v2 = vshrl.u32 %v1762_v0, 16  ;;  %v105_v3 = vshll.u32 %v1762_v0, 16  ;;  %v110_v4 = vshll.u32 %v1767_v1, 16  ;;  %v114_v5 = vshrl.u32 %v1767_v1, 16  ;;  %v1776_v6 = vld [vmem:[%s2124_s0 + $0x10] sm:$0xff]  ;;  %s1721_s30 = smov 8  }
   0x7   :  { %vm225_vm1 = vsmask.f32 6400  ;;  %v118_v15 = vshll.u32 %v1776_v6, 16  ;;  %s1722_s6 = smov 24   ;;  %v191_v21 = vrot.slane %v1762_v0, 1  ;;  %v192_v22 = vrot.slane %v1767_v1, 1 }
   0x8   :  { %v107_v7 = vrot.slane %v105_v3, 1  ;;  %v112_v8 = vrot.slane %v110_v4, 1  ;;  %v226_v9 = vrot.slane %v103_v2, 1  ;;  %v227_v10 = vrot.slane %v105_v3, 2  ;;  %v1796_v32 = vld [vmem:[%s2124_s0 + $0x18] sm:$0xff]  ;;  %s1723_s9 = smov 16  }
   0x9   :  { %v229_v11 = vrot.slane %v114_v5, 1  ;;  %v230_v12 = vrot.slane %v110_v4, 2  ;;  %v120_v19 = vrot.slane %v118_v15, 1  ;;  %v122_v23 = vshrl.u32 %v1776_v6, 16  ;;  %s1724_s10 = smov 32   ;;  %v1821_v55 = vld [vmem:[%s2124_s0 + $0x24] sm:$0xff] }
   0xa   :  { %v108_v13 = vor.u32 %v107_v7, %v103_v2  ;;  %v228_v14 = vor.u32 %v227_v10, %v226_v9  ;;  %v116_v17 = vor.u32 %v114_v5, %v112_v8  ;;  %vm190_vm2 = vcmask 1046528   ;;  %v45_v38 = vld [vmem:[%s2124_s0 + $0x20] sm:$0x3]  ;;  %v1830_v62 = vld [vmem:[%s2124_s0 + $0x2c] sm:$0xff] }
   0xb   :  { %v231_v16 = vor.u32 %v230_v12, %v229_v11  ;;  %v285_v25 = vrot.slane %v1762_v0, 2  ;;  %v286_v26 = vrot.slane %v1767_v1, 2  ;;  %vm284_vm3 = vcmask 1045504  }
   0xc   :  { %v113_v18 = vsel %vm101_vm0, %v108_v13, %v112_v8  ;;  %v121_v24 = vsel %vm101_vm0, %v116_v17, %v120_v19  ;;  %v193_v27 = vsel %vm190_vm2, %v191_v21, %v192_v22  ;;  %v233_v28 = vrot.slane %v122_v23, 1 }
   0xd   :  { %174 = vrot.lane.b32.xlu0 %v113_v18, %s1721_s30  ;;  %v232_v20 = vsel %vm225_vm1, %v228_v14, %v231_v16  ;;  %176 = vrot.lane.b32.xlu2 %v121_v24, %s1721_s30  ;;  %v234_v29 = vrot.slane %v118_v15, 2  ;;  %v194_v30 = vrot.slane %v1776_v6, 1  ;;  %v287_v31 = vsel %vm284_vm3, %v285_v25, %v286_v26 }
   0xe   :  { %268 = vrot.lane.b32.xlu1 %v232_v20, %s1722_s6  ;;  %v288_v35 = vrot.slane %v1776_v6, 2  ;;  %v126_v36 = vshll.u32 %v1796_v32, 16  ;;  %v130_v37 = vshrl.u32 %v1796_v32, 16  ;;  %v124_v39 = vor.u32 %v122_v23, %v120_v19 }
   0xf   :  { %v195_v33 = vsel %vm190_vm2, %v192_v22, %v194_v30  ;;  %v235_v34 = vor.u32 %v234_v29, %v233_v28  ;;  %v97_v41 = vunpack.c.l.b16 %v45_v38  ;;  %v196_v47 = vrot.slane %v1796_v32, 1  ;;  %v1849_v22 = vld [vmem:[%s2124_s0 + $0x34] sm:$0xff] }
  0x10   :  { %v128_v42 = vrot.slane %v126_v36, 1  ;;  %v289_v43 = vsel %vm284_vm3, %v286_v26, %v288_v35  ;;  %v237_v44 = vrot.slane %v130_v37, 1  ;;  %v238_v45 = vrot.slane %v126_v36, 2 }
  0x11   :  { %v236_v40 = vsel %vm225_vm1, %v231_v16, %v235_v34  ;;  %v99_v48 = vpack.c.b16 %v97_v41, %v97_v41  ;;  %v197_v51 = vsel %vm190_vm2, %v194_v30, %v196_v47  ;;  %v290_v53 = vrot.slane %v1796_v32, 2  ;;  %v54_v41 = vld [vmem:[%s2124_s0 + $0x44] sm:$0x3] }
  0x12   :  { %v129_v46 = vsel %vm101_vm0, %v124_v39, %v128_v42  ;;  %v239_v49 = vor.u32 %v238_v45, %v237_v44  ;;  %v132_v59 = vor.u32 %v130_v37, %v128_v42  ;;  %v141_v63 = vshll.u32 %v1821_v55, 16  ;;  %v1868_v39 = vld [vmem:[%s2124_s0 + $0x3c] sm:$0xff] }
  0x13   :  { %v241_v50 = vshrl.u32 %v99_v48, 16  ;;  %v134_v52 = vshll.u32 %v99_v48, 16  ;;  %v291_v56 = vsel %vm284_vm3, %v288_v35, %v290_v53  ;;  %v198_v61 = vrot.slane %v99_v48, 1 }
  0x14   :  { %v240_v54 = vsel %vm225_vm1, %v235_v34, %v239_v49  ;;  %v139_v5 = vshrl.u32 %v1821_v55, 16  ;;  %v143_v7 = vrot.slane %v141_v63, 1  ;;  %v146_v8 = vshll.u32 %v1830_v62, 16 }
  0x15   :  { %209 = vrot.lane.b32.xlu0 %v193_v27, %s1723_s9  ;;  %211 = vrot.lane.b32.xlu2 %v195_v33, %s1723_s9  ;;  %v243_v57 = vrot.slane %v241_v50, 1  ;;  %v244_v58 = vrot.slane %v134_v52, 2  ;;  %v136_v60 = vrot.slane %v134_v52, 1  ;;  %v199_v4 = vsel %vm190_vm2, %v196_v47, %v198_v61 }
  0x16   :  { %303 = vrot.lane.b32.xlu1 %v287_v31, %s1724_s10  ;;  %v292_v10 = vrot.slane %v99_v48, 2  ;;  %v150_v11 = vshrl.u32 %v1830_v62, 16  ;;  %v144_v12 = vor.u32 %v143_v7, %v139_v5  ;;  %v148_v13 = vrot.slane %v146_v8, 1 }
  0x17   :  { %v245_v2 = vor.u32 %v244_v58, %v243_v57  ;;  %v137_v3 = vsel %vm101_vm0, %v132_v59, %v136_v60  ;;  %v200_v14 = vrot.slane %v1821_v55, 1  ;;  %v247_v16 = vrot.slane %v139_v5, 1 }
  0x18   :  { %v293_v15 = vsel %vm284_vm3, %v290_v53, %v292_v10  ;;  %v248_v17 = vrot.slane %v141_v63, 2  ;;  %v250_v18 = vrot.slane %v150_v11, 1  ;;  %v251_v19 = vrot.slane %v146_v8, 2  ;;  %v391_v63 = vld [vmem:[%s2125_s1 + $0x10] sm:$0xf] }
  0x19   :  { %v246_v9 = vsel %vm225_vm1, %v239_v49, %v245_v2  ;;  %v201_v20 = vrot.slane %v1830_v62, 1  ;;  %v149_v21 = vsel %vm101_vm0, %v144_v12, %v148_v13  ;;  %v294_v26 = vrot.slane %v1821_v55, 2 }
  0x1a   :  { %v249_v24 = vor.u32 %v248_v17, %v247_v16  ;;  %v252_v25 = vor.u32 %v251_v19, %v250_v18  ;;  %v295_v27 = vrot.slane %v1830_v62, 2  ;;  %v154_v28 = vshll.u32 %v1849_v22, 16  ;;  %v1624_v17 = vld [vmem:[%s2125_s1] sm:$0xff] }
  0x1b   :  { %v202_v23 = vsel %vm190_vm2, %v200_v14, %v201_v20  ;;  %v158_v29 = vshrl.u32 %v1849_v22, 16  ;;  %v152_v30 = vor.u32 %v150_v11, %v148_v13  ;;  %v203_v38 = vrot.slane %v1849_v22, 1 }
  0x1c   :  { %v253_v31 = vsel %vm225_vm1, %v249_v24, %v252_v25  ;;  %v156_v33 = vrot.slane %v154_v28, 1  ;;  %v296_v34 = vsel %vm284_vm3, %v294_v26, %v295_v27  ;;  %v255_v36 = vrot.slane %v154_v28, 2 }
  0x1d   :  { %270 = vrot.lane.b32.xlu0 %v236_v40, %s1722_s6  ;;  %178 = vrot.lane.b32.xlu2 %v129_v46, %s1721_s30  ;;  %v254_v35 = vrot.slane %v158_v29, 1  ;;  %v204_v42 = vsel %vm190_vm2, %v201_v20, %v203_v38  ;;  %v297_v44 = vrot.slane %v1849_v22, 2  ;;  %v98_v46 = vunpack.c.l.b16 %v54_v41 }
  0x1e   :  { %305 = vrot.lane.b32.xlu1 %v289_v43, %s1724_s10  ;;  %v157_v37 = vsel %vm101_vm0, %v152_v30, %v156_v33  ;;  %v162_v43 = vshll.u32 %v1868_v39, 16  ;;  %v160_v48 = vor.u32 %v158_v29, %v156_v33  ;;  %v205_v50 = vrot.slane %v1868_v39, 1 }
  0x1f   :  { %v256_v40 = vor.u32 %v255_v36, %v254_v35  ;;  %v298_v47 = vsel %vm284_vm3, %v295_v27, %v297_v44  ;;  %v299_v57 = vrot.slane %v1868_v39, 2  ;;  %vm424_vm4 = vcmask 1043456  }
  0x20   :  { %v164_v49 = vrot.slane %v162_v43, 1  ;;  %v206_v53 = vsel %vm190_vm2, %v203_v38, %v205_v50  ;;  %v259_v5 = vrot.slane %v162_v43, 2  ;;  %vm319_vm5 = vcmask 64512  }
  0x21   :  { %v257_v45 = vsel %vm225_vm1, %v252_v25, %v256_v40  ;;  %v300_v60 = vsel %vm284_vm3, %v297_v44, %v299_v57  ;;  %vm336_vm6 = vcmask 130048   ;;  %vm353_vm7 = vcmask 195584  }
  0x22   :  { %v165_v52 = vsel %vm101_vm0, %v160_v48, %v164_v49  ;;  %vm370_vm8 = vcmask 261120   ;;  %vm407_vm9 = vcmask 326656   ;;  %vm1215_vm10 = vcmask 1044480  }
  0x25   :  { %213 = vrot.lane.b32.xlu0 %v197_v51, %s1723_s9  ;;  %307 = vrot.lane.b32.xlu2 %v291_v56, %s1724_s10  ;;  %v100_v51 = vpack.c.b16 %v98_v46, %v98_v46 }
  0x26   :  { %272 = vrot.lane.b32.xlu1 %v240_v54, %s1722_s6  ;;  %v166_v54 = vshrl.u32 %v1868_v39, 16 }
  0x27   :  { %v170_v56 = vshll.u32 %v100_v51, 16  ;;  %v262_v2 = vshrl.u32 %v100_v51, 16  ;;  %v301_v13 = vrot.slane %v100_v51, 2  ;;  %v207_v19 = vrot.slane %v100_v51, 1 }
  0x28   :  { %v168_v58 = vor.u32 %v166_v54, %v164_v49 }
  0x29   :  { %v172_v59 = vrot.slane %v170_v56, 1  ;;  %v264_v7 = vrot.slane %v262_v2, 1  ;;  %v265_v8 = vrot.slane %v170_v56, 2  ;;  %v302_v16 = vsel %vm284_vm3, %v299_v57, %v301_v13 }
  0x2a   :  { %v208_v20 = vsel %vm190_vm2, %v205_v50, %v207_v19 }
  0x2b   :  { %v173_v61 = vsel %vm101_vm0, %v168_v58, %v172_v59  ;;  %v266_v11 = vor.u32 %v265_v8, %v264_v7 }
  0x2d   :  { %180 = vrot.lane.b32.xlu0 %v137_v3, %s1721_s30  ;;  %274 = vrot.lane.b32.xlu2 %v246_v9, %s1722_s6  ;;  %v401_v3 = vunpack.c.l.b16 %v391_v63 }
  0x2e   :  { %215 = vrot.lane.b32.xlu1 %v199_v4, %s1723_s9  ;;  %v258_v4 = vrot.slane %v166_v54, 1 }
  0x2f   :  { %v404_v9 = vpack.c.b16 %v401_v3, %v401_v3 }
  0x30   :  { %v260_v10 = vor.u32 %v259_v5, %v258_v4 }
  0x31   :  { %v426_v12 = vsel %vm424_vm4, %v404_v9, 0 }
  0x32   :  { %433 = vmatpush.bf16.msra.mxu0 %v426_v12  ;;  %v267_v14 = vsel %vm225_vm1, %v260_v10, %v266_v11  ;;  %v261_v18 = vsel %vm225_vm1, %v256_v40, %v260_v10 }
  0x35   :  { %309 = vrot.lane.b32.xlu0 %v293_v15, %s1724_s10  ;;  %217 = vrot.lane.b32.xlu2 %v202_v23, %s1723_s9  ;;  %v1625_v15 = vld [vmem:[%s2125_s1 + $0x8] sm:$0xff] }
  0x36   :  { %182 = vrot.lane.b32.xlu1 %v149_v21, %s1721_s30  ;;  %434 = vmatpush.bf16.msra.mxu0 %v1625_v15 }
  0x3a   :  { %435 = vmatpush.bf16.msra.mxu0 %v1624_v17 }
  0x3d   :  { %276 = vrot.lane.b32.xlu0 %v253_v31, %s1722_s6  ;;  %184 = vrot.lane.b32.xlu2 %v157_v37, %s1721_s30 }
  0x3e   :  { %311 = vrot.lane.b32.xlu1 %v296_v34, %s1724_s10 }
  0x45   :  { %219 = vrot.lane.b32.xlu0 %v204_v42, %s1723_s9  ;;  %313 = vrot.lane.b32.xlu2 %v298_v47, %s1724_s10 }
  0x46   :  { %278 = vrot.lane.b32.xlu1 %v257_v45, %s1722_s6 }
  0x4d   :  { %186 = vrot.lane.b32.xlu0 %v165_v52, %s1721_s30  ;;  %280 = vrot.lane.b32.xlu2 %v261_v18, %s1722_s6 }
  0x4e   :  { %221 = vrot.lane.b32.xlu1 %v206_v53, %s1723_s9 }
  0x55   :  { %315 = vrot.lane.b32.xlu0 %v300_v60, %s1724_s10  ;;  %223 = vrot.lane.b32.xlu2 %v208_v20, %s1723_s9 }
  0x56   :  { %188 = vrot.lane.b32.xlu1 %v173_v61, %s1721_s30 }
  0x5d   :  { %282 = vrot.lane.b32.xlu0 %v267_v14, %s1722_s6 }
  0x5e   :  { %317 = vrot.lane.b32.xlu1 %v302_v16, %s1724_s10 }
  0x67   :  { %v177_v26 = vpop.permute.xlu2 %176 }
  0x68   :  { %v323_v31 = vsel %vm319_vm5, %v1767_v1, %v177_v26  ;;  %v1600_v26 = vld [vmem:[#allocation2 + $0x12c] sm:$0xf0] }
  0x6f   :  { %v212_v33 = vpop.permute.xlu2 %211 }
  0x70   :  { %v340_v34 = vsel %vm336_vm6, %v323_v31, %v212_v33  ;;  %v1580_v33 = vld [vmem:[#allocation2 + $0x104] sm:$0xf0] }
  0x77   :  { %v179_v38 = vpop.permute.xlu2 %178 }
  0x78   :  { %v325_v40 = vsel %vm319_vm5, %v1776_v6, %v179_v38  ;;  %v1560_v38 = vld [vmem:[#allocation2 + $0xdc] sm:$0xf0] }
  0x7f   :  { %v175_v21 = vpop.permute.xlu0 %174  ;;  %v308_v44 = vpop.permute.xlu2 %307 }
  0x80   :  { %v269_v23 = vpop.permute.xlu1 %268  ;;  %v321_v24 = vsel %vm319_vm5, %v1762_v0, %v175_v21  ;;  %v1598_v21 = vld [vmem:[#allocation2 + $0x118] sm:$0xf] }
  0x87   :  { %v210_v25 = vpop.permute.xlu0 %209  ;;  %v275_v50 = vpop.permute.xlu2 %274 }
  0x88   :  { %v338_v27 = vsel %vm336_vm6, %v321_v24, %v210_v25  ;;  %v304_v28 = vpop.permute.xlu1 %303  ;;  %v1661_v24 = vld [vmem:[#allocation2 + $0x11c] sm:$0xf] }
  0x89   :  { %v355_v29 = vsel %vm353_vm7, %v338_v27, %v269_v23  ;;  %v1663_v23 = vld [vmem:[#allocation2 + $0x128] sm:$0xf0]  ;;  %v1603_v27 = vor.u32 %v1661_v24, %v1600_v26 }
  0x8a   :  { %v372_v30 = vsel %vm370_vm8, %v355_v29, %v304_v28  ;;  %v1599_v25 = vor.u32 %v1663_v23, %v1598_v21  ;;  %v1658_v29 = vld [vmem:[#allocation2 + $0x100] sm:$0xf0] }
  0x8b   :  { %1448 = vmatmul.msk.bf16.vlgmr.msra.gmra.mxu0 %vm407_vm9, %v372_v30  ;;  %1013 = vmatpush.bf16.msra.mxu2 %v1603_v27  ;;  %v1656_v30 = vld [vmem:[#allocation2 + $0xf4] sm:$0xf] }
  0x8c   :  { %984 = vmatpush.bf16.msra.mxu1 %v1599_v25  ;;  %1666 = vmatpush.bf16.msra.mxu3 %v1599_v25 }
  0x8f   :  { %v271_v0 = vpop.permute.xlu0 %270  ;;  %v218_v56 = vpop.permute.xlu2 %217 }
  0x90   :  { %v357_v35 = vsel %vm353_vm7, %v340_v34, %v271_v0  ;;  %v306_v36 = vpop.permute.xlu1 %305  ;;  %v1583_v34 = vor.u32 %v1656_v30, %v1580_v33  ;;  %v1558_v0 = vld [vmem:[#allocation2 + $0xc8] sm:$0xf] }
  0x91   :  { %v374_v37 = vsel %vm370_vm8, %v357_v35, %v306_v36  ;;  %v1653_v35 = vld [vmem:[#allocation2 + $0xd8] sm:$0xf0]  ;;  %v1651_v36 = vld [vmem:[#allocation2 + $0xcc] sm:$0xf] }
  0x92   :  { %1014 = vmatpush.bf16.msra.mxu2 %v1583_v34  ;;  %v1662_v34 = vld [vmem:[#allocation2 + $0x124] sm:$0xf] }
  0x97   :  { %v214_v41 = vpop.permute.xlu0 %213  ;;  %v185_v61 = vpop.permute.xlu2 %184 }
  0x98   :  { %v342_v42 = vsel %vm336_vm6, %v325_v40, %v214_v41  ;;  %v273_v43 = vpop.permute.xlu1 %272  ;;  %v331_v63 = vsel %vm319_vm5, %v1830_v62, %v185_v61  ;;  %v1563_v40 = vor.u32 %v1651_v36, %v1560_v38  ;;  %v1538_v41 = vld [vmem:[#allocation2 + $0xa0] sm:$0xf]  ;;  %v1636_v61 = vld [vmem:[#allocation2 + $0x54] sm:$0xf] }
  0x99   :  { %v359_v1 = vsel %vm353_vm7, %v342_v42, %v273_v43  ;;  %v1648_v42 = vld [vmem:[#allocation2 + $0xb0] sm:$0xf0]  ;;  %v1646_v43 = vld [vmem:[#allocation2 + $0xa4] sm:$0xf] }
  0x9a   :  { %v376_v45 = vsel %vm370_vm8, %v359_v1, %v308_v44  ;;  %1015 = vmatpush.bf16.msra.mxu2 %v1563_v40  ;;  %v1539_v1 = vor.u32 %v1648_v42, %v1538_v41  ;;  %v1540_v44 = vld [vmem:[#allocation2 + $0xb4] sm:$0xf0]  ;;  %v1657_v41 = vld [vmem:[#allocation2 + $0xfc] sm:$0xf]  ;;  %v1588_v42 = vld [vmem:[#allocation2 + $0x10c] sm:$0xf0] }
  0x9b   :  { %1449 = vmatmul.msk.bf16.gmra.mxu0 %vm407_vm9, %v374_v37  ;;  %v1559_v37 = vor.u32 %v1653_v35, %v1558_v0  ;;  %v1608_v0 = vld [vmem:[#allocation2 + $0x134] sm:$0xf0] }
  0x9c   :  { %v1611_v36 = vor.u32 %v1662_v34, %v1608_v0 }
  0x9f   :  { %v181_v46 = vpop.permute.xlu0 %180  ;;  %v314_v5 = vpop.permute.xlu2 %313 }
  0xa0   :  { %v327_v47 = vsel %vm319_vm5, %v1796_v32, %v181_v46  ;;  %v216_v48 = vpop.permute.xlu1 %215  ;;  %v1725_v46 = vmov 1966171168  }
  0xa1   :  { %v344_v49 = vsel %vm336_vm6, %v327_v47, %v216_v48  ;;  %v514_v47 = vunpack.c.l.s4 %v1725_v46  ;;  %v1543_v48 = vor.u32 %v1646_v43, %v1540_v44 }
  0xa2   :  { %v361_v6 = vsel %vm353_vm7, %v344_v49, %v275_v50  ;;  %v1518_v49 = vld [vmem:[#allocation2 + $0x78] sm:$0xf]  ;;  %v1643_v50 = vld [vmem:[#allocation2 + $0x88] sm:$0xf0] }
  0xa3   :  { %1016 = vmatpush.bf16.msra.mxu2 %v1543_v48  ;;  %v1568_v48 = vld [vmem:[#allocation2 + $0xe4] sm:$0xf0] }
  0xa7   :  { %v310_v51 = vpop.permute.xlu0 %309  ;;  %v281_v12 = vpop.permute.xlu2 %280 }
  0xa8   :  { %v378_v52 = vsel %vm370_vm8, %v361_v6, %v310_v51  ;;  %v183_v53 = vpop.permute.xlu1 %182  ;;  %v1641_v6 = vld [vmem:[#allocation2 + $0x7c] sm:$0xf] }
  0xa9   :  { %v329_v54 = vsel %vm319_vm5, %v1821_v55, %v183_v53  ;;  %v1520_v53 = vld [vmem:[#allocation2 + $0x8c] sm:$0xf0] }
  0xaa   :  { %v346_v57 = vsel %vm336_vm6, %v329_v54, %v218_v56  ;;  %v1965_v56 = vunpack.c.0.s8 %v514_v47  ;;  %v1652_v47 = vld [vmem:[#allocation2 + $0xd4] sm:$0xf] }
  0xab   :  { %1450 = vmatmul.msk.bf16.gmra.mxu0 %vm407_vm9, %v376_v45  ;;  %v1962_v45 = vld [vmem:[%s2126_s2] ss:$0 sm:$0xff] }
  0xaf   :  { %v277_v58 = vpop.permute.xlu0 %276  ;;  %v224_v17 = vpop.permute.xlu2 %223 }
  0xb0   :  { %v363_v32 = vsel %vm353_vm7, %v346_v57, %v277_v58  ;;  %v312_v59 = vpop.permute.xlu1 %311  ;;  %v1523_v57 = vor.u32 %v1641_v6, %v1520_v53 }
  0xb1   :  { %v380_v60 = vsel %vm370_vm8, %v363_v32, %v312_v59  ;;  %v1498_v32 = vld [vmem:[#allocation2 + $0x50] sm:$0xf]  ;;  %v1638_v59 = vld [vmem:[#allocation2 + $0x60] sm:$0xf0] }
  0xb2   :  { %1017 = vmatpush.bf16.msra.mxu2 %v1523_v57 }
  0xb7   :  { %v220_v2 = vpop.permute.xlu0 %219 }
  0xb8   :  { %v348_v3 = vsel %vm336_vm6, %v331_v63, %v220_v2  ;;  %v279_v4 = vpop.permute.xlu1 %278  ;;  %v1500_v63 = vld [vmem:[#allocation2 + $0x64] sm:$0xf0] }
  0xb9   :  { %v365_v55 = vsel %vm353_vm7, %v348_v3, %v279_v4  ;;  %v1503_v3 = vor.u32 %v1636_v61, %v1500_v63 }
  0xba   :  { %v382_v7 = vsel %vm370_vm8, %v365_v55, %v314_v5  ;;  %v1478_v55 = vld [vmem:[#allocation2 + $0x28] sm:$0xf]  ;;  %v1633_v5 = vld [vmem:[#allocation2 + $0x38] sm:$0xf0] }
  0xbb   :  { %1451 = vmatmul.msk.bf16.gmra.mxu0 %vm407_vm9, %v378_v52  ;;  %v1519_v52 = vor.u32 %v1643_v50, %v1518_v49  ;;  %1018 = vmatpush.bf16.msra.mxu2 %v1503_v3  ;;  %v1571_v50 = vor.u32 %v1652_v47, %v1568_v48 }
  0xbf   :  { %v187_v8 = vpop.permute.xlu0 %186 }
  0xc0   :  { %v333_v9 = vsel %vm319_vm5, %v1849_v22, %v187_v8  ;;  %v222_v10 = vpop.permute.xlu1 %221  ;;  %v1479_v8 = vor.u32 %v1633_v5, %v1478_v55  ;;  %v1528_v55 = vld [vmem:[#allocation2 + $0x94] sm:$0xf0] }
  0xc1   :  { %v350_v11 = vsel %vm336_vm6, %v333_v9, %v222_v10  ;;  %v1631_v9 = vld [vmem:[#allocation2 + $0x2c] sm:$0xf]  ;;  %v1480_v10 = vld [vmem:[#allocation2 + $0x3c] sm:$0xf0] }
  0xc2   :  { %v367_v62 = vsel %vm353_vm7, %v350_v11, %v281_v12 }
  0xc7   :  { %v316_v13 = vpop.permute.xlu0 %315 }
  0xc8   :  { %v384_v14 = vsel %vm370_vm8, %v367_v62, %v316_v13  ;;  %v189_v15 = vpop.permute.xlu1 %188  ;;  %v1483_v62 = vor.u32 %v1631_v9, %v1480_v10 }
  0xc9   :  { %v335_v16 = vsel %vm319_vm5, %v1868_v39, %v189_v15  ;;  %v1578_v39 = vld [vmem:[#allocation2 + $0xf0] sm:$0xf]  ;;  %v1628_v15 = vld [vmem:[#allocation2 + $0x10] sm:$0xf0] }
  0xca   :  { %v352_v18 = vsel %vm336_vm6, %v335_v16, %v224_v17  ;;  %v1579_v31 = vor.u32 %v1658_v29, %v1578_v39  ;;  %1019 = vmatpush.bf16.msra.mxu2 %v1483_v62  ;;  %v1626_v16 = vld [vmem:[#allocation2 + $0x4] sm:$0xf]  ;;  %v1460_v17 = vld [vmem:[#allocation2 + $0x14] sm:$0xf0] }
  0xcb   :  { %1452 = vmatmul.msk.bf16.gmra.mxu0 %vm407_vm9, %v380_v60  ;;  %v1499_v60 = vor.u32 %v1638_v59, %v1498_v32  ;;  %v1548_v32 = vld [vmem:[#allocation2 + $0xbc] sm:$0xf0] }
  0xcc   :  { %985 = vmatpush.bf16.msra.mxu1 %v1579_v31  ;;  %1667 = vmatpush.bf16.msra.mxu3 %v1579_v31 }
  0xcf   :  { %v283_v19 = vpop.permute.xlu0 %282 }
  0xd0   :  { %v369_v22 = vsel %vm353_vm7, %v352_v18, %v283_v19  ;;  %v318_v20 = vpop.permute.xlu1 %317  ;;  %986 = vmatpush.bf16.msra.mxu1 %v1559_v37  ;;  %1668 = vmatpush.bf16.msra.mxu3 %v1559_v37 }
  0xd1   :  { %v386_v28 = vsel %vm370_vm8, %v369_v22, %v318_v20  ;;  %v1463_v22 = vor.u32 %v1626_v16, %v1460_v17  ;;  %v1488_v16 = vld [vmem:[#allocation2 + $0x44] sm:$0xf0] }
  0xd3   :  { %1020 = vmatpush.bf16.msra.mxu2 %v1463_v22 }
  0xd4   :  { %987 = vmatpush.bf16.msra.mxu1 %v1539_v1  ;;  %1669 = vmatpush.bf16.msra.mxu3 %v1539_v1  ;;  %v1591_v1 = vor.u32 %v1657_v41, %v1588_v42 }
  0xd8   :  { %988 = vmatpush.bf16.msra.mxu1 %v1519_v52  ;;  %1670 = vmatpush.bf16.msra.mxu3 %v1519_v52 }
  0xdb   :  { %1453 = vmatmul.msk.bf16.gmra.mxu0 %vm407_vm9, %v382_v7 }
  0xdc   :  { %989 = vmatpush.bf16.msra.mxu1 %v1499_v60  ;;  %1671 = vmatpush.bf16.msra.mxu3 %v1499_v60 }
  0xe0   :  { %990 = vmatpush.bf16.msra.mxu1 %v1479_v8  ;;  %1672 = vmatpush.bf16.msra.mxu3 %v1479_v8 }
  0xeb   :  { %1454 = vmatmul.msk.bf16.gmra.mxu0 %vm407_vm9, %v384_v14  ;;  %v1458_v14 = vld [vmem:[#allocation2] sm:$0xf] }
  0xec   :  { %v1459_v19 = vor.u32 %v1628_v15, %v1458_v14  ;;  %v1632_v15 = vld [vmem:[#allocation2 + $0x34] sm:$0xf] }
  0xee   :  { %991 = vmatpush.bf16.msra.mxu1 %v1459_v19  ;;  %1673 = vmatpush.bf16.msra.mxu3 %v1459_v19 }
  0xf2   :  { %1071 = vmatpush.bf16.msrb.mxu1 %v1611_v36 }
  0xf6   :  { %1072 = vmatpush.bf16.msrb.mxu1 %v1591_v1 }
  0xfa   :  { %1073 = vmatpush.bf16.msrb.mxu1 %v1571_v50 }
  0xfb   :  { %1455 = vmatmul.msk.bf16.gmra.mxu0 %vm407_vm9, %v386_v28 }
 0x108   :  { %v437_v51 = vpop.f32.mrf.mxu0 }
 0x109   :  { %v481_v54 = vadd.f32 %v1962_v45, %v437_v51 }
 0x10b   :  { %v497_v58 = vmax.f32 %v481_v54, 0.0 }
 0x10d   :  { %v516_v2 = vperm.slane %v497_v58, %v1965_v56  ;;  %v1647_v58 = vld [vmem:[#allocation2 + $0xac] sm:$0xf] }
 0x10e   :  { %v1551_v63 = vor.u32 %v1647_v58, %v1548_v32  ;;  %v1665_v58 = vld [vmem:[#allocation2 + $0x138] sm:$0xf0] }
 0x10f   :  { %v593_v4 = vrot.slane %v516_v2, 4 }
 0x110   :  { %v439_v7 = vpop.f32.mrf.mxu0  ;;  %1074 = vmatpush.bf16.msrb.mxu1 %v1551_v63  ;;  %v1606_v63 = vld [vmem:[#allocation2 + $0x120] sm:$0xf] }
 0x111   :  { %v625_v11 = vmax.f32 %v516_v2, %v593_v4  ;;  %v482_v12 = vadd.f32 %v1962_v45, %v439_v7  ;;  %v1642_v4 = vld [vmem:[#allocation2 + $0x84] sm:$0xf] }
 0x112   :  { %v1531_v7 = vor.u32 %v1642_v4, %v1528_v55 }
 0x113   :  { %657 = vst [vmem:[#allocation1] ss:$2 sm:$0xff] %v625_v11  ;;  %v498_v13 = vmax.f32 %v482_v12, 0.0  ;;  %v1637_v11 = vld [vmem:[#allocation2 + $0x5c] sm:$0xf] }
 0x114   :  { %1075 = vmatpush.bf16.msrb.mxu1 %v1531_v7  ;;  %v1508_v12 = vld [vmem:[#allocation2 + $0x6c] sm:$0xf0] }
 0x115   :  { %v520_v18 = vperm.slane %v498_v13, %v1965_v56  ;;  %v1511_v13 = vor.u32 %v1637_v11, %v1508_v12  ;;  %v1659_v11 = vld [vmem:[#allocation2 + $0x108] sm:$0xf0] }
 0x117   :  { %v594_v20 = vrot.slane %v520_v18, 4 }
 0x118   :  { %v442_v21 = vpop.f32.mrf.mxu0  ;;  %1076 = vmatpush.bf16.msrb.mxu1 %v1511_v13 }
 0x119   :  { %v626_v23 = vmax.f32 %v520_v18, %v594_v20  ;;  %v483_v24 = vadd.f32 %v1962_v45, %v442_v21  ;;  %v1491_v18 = vor.u32 %v1632_v15, %v1488_v16  ;;  %v1627_v21 = vld [vmem:[#allocation2 + $0xc] sm:$0xf]  ;;  %v1566_v16 = vld [vmem:[#allocation2 + $0xd0] sm:$0xf] }
 0x11a   :  { %v1655_v15 = vld [vmem:[#allocation2 + $0xe8] sm:$0xf0] }
 0x11b   :  { %659 = vst [vmem:[#allocation1 + $0x1] ss:$2 sm:$0xff] %v626_v23  ;;  %v499_v25 = vmax.f32 %v483_v24, 0.0  ;;  %v1468_v23 = vld [vmem:[#allocation2 + $0x1c] sm:$0xf0] }
 0x11c   :  { %1077 = vmatpush.bf16.msrb.mxu1 %v1491_v18  ;;  %v1654_v18 = vld [vmem:[#allocation2 + $0xe0] sm:$0xf0] }
 0x11d   :  { %v524_v26 = vperm.slane %v499_v25, %v1965_v56  ;;  %v1471_v25 = vor.u32 %v1627_v21, %v1468_v23  ;;  %v1546_v21 = vld [vmem:[#allocation2 + $0xa8] sm:$0xf]  ;;  %v1649_v23 = vld [vmem:[#allocation2 + $0xb8] sm:$0xf0] }
 0x11f   :  { %v595_v27 = vrot.slane %v524_v26, 4 }
 0x120   :  { %v444_v28 = vpop.f32.mrf.mxu0  ;;  %1078 = vmatpush.bf16.msrb.mxu1 %v1471_v25  ;;  %v1554_v25 = vld [vmem:[#allocation2 + $0xb0] sm:$0xf] }
 0x121   :  { %v627_v39 = vmax.f32 %v524_v26, %v595_v27  ;;  %v484_v29 = vadd.f32 %v1962_v45, %v444_v28 }
 0x122   :  { %v672_v44 = vld.sshfl [vmem:[#allocation1] sm:$0xff pattern:$0x75316420] }
 0x123   :  { %661 = vst [vmem:[#allocation1 + $0x10] ss:$2 sm:$0xff] %v627_v39  ;;  %v500_v30 = vmax.f32 %v484_v29, 0.0  ;;  %v696_v52 = vpack.c.bf16 %v672_v44, %v672_v44 }
 0x125   :  { %v528_v31 = vperm.slane %v500_v30, %v1965_v56  ;;  %v760_v60 = vunpack.c.l.b16 %v696_v52 }
 0x127   :  { %v596_v33 = vrot.slane %v528_v31, 4 }
 0x128   :  { %v447_v35 = vpop.f32.mrf.mxu0 }
 0x129   :  { %v628_v37 = vmax.f32 %v528_v31, %v596_v33  ;;  %v485_v38 = vadd.f32 %v1962_v45, %v447_v35 }
 0x12b   :  { %663 = vst [vmem:[#allocation1 + $0x11] ss:$2 sm:$0xff] %v628_v37  ;;  %v501_v40 = vmax.f32 %v485_v38, 0.0 }
 0x12d   :  { %v532_v43 = vperm.slane %v501_v40, %v1965_v56 }
 0x12f   :  { %v597_v46 = vrot.slane %v532_v43, 4 }
 0x130   :  { %v449_v49 = vpop.f32.mrf.mxu0 }
 0x131   :  { %v629_v6 = vmax.f32 %v532_v43, %v597_v46  ;;  %v486_v51 = vadd.f32 %v1962_v45, %v449_v49 }
 0x132   :  { %v673_v53 = vld.sshfl [vmem:[#allocation1 + $0x10] sm:$0xff pattern:$0x75316420] }
 0x133   :  { %665 = vst [vmem:[#allocation1 + $0x20] ss:$2 sm:$0xff] %v629_v6  ;;  %v502_v54 = vmax.f32 %v486_v51, 0.0  ;;  %v697_v57 = vpack.c.bf16 %v673_v53, %v673_v53 }
 0x135   :  { %v536_v59 = vperm.slane %v502_v54, %v1965_v56  ;;  %v761_v61 = vunpack.c.l.b16 %v697_v57  ;;  %v1614_v57 = vld [vmem:[#allocation2 + $0x128] sm:$0xf] }
 0x137   :  { %v598_v2 = vrot.slane %v536_v59, 4  ;;  %v1978_v3 = vpack.c.b16 %v761_v61, %v760_v60 }
 0x138   :  { %v452_v5 = vpop.f32.mrf.mxu0 }
 0x139   :  { %v630_v8 = vmax.f32 %v536_v59, %v598_v2  ;;  %v487_v9 = vadd.f32 %v1962_v45, %v452_v5  ;;  %992 = vmatmul.bf16.vlgmr.msra.gmra.mxu1 %v1978_v3  ;;  %1021 = vmatmul.bf16.vlgmr.msra.gmra.mxu2 %v1978_v3  ;;  %v1615_v59 = vor.u32 %v1665_v58, %v1614_v57  ;;  %v1664_v2 = vld [vmem:[#allocation2 + $0x130] sm:$0xf0]  ;;  %v1486_v58 = vld [vmem:[#allocation2 + $0x30] sm:$0xf] }
 0x13a   :  { %v1607_v5 = vor.u32 %v1664_v2, %v1606_v63 }
 0x13b   :  { %667 = vst [vmem:[#allocation1 + $0x21] ss:$2 sm:$0xff] %v630_v8  ;;  %v503_v10 = vmax.f32 %v487_v9, 0.0  ;;  %1674 = vmatpush.bf16.msrb.mxu2 %v1615_v59  ;;  %1100 = vmatpush.bf16.msra.mxu1 %v1615_v59  ;;  %v1594_v8 = vld [vmem:[#allocation2 + $0x100] sm:$0xf] }
 0x13c   :  { %1042 = vmatpush.bf16.msrb.mxu3 %v1607_v5  ;;  %v1660_v9 = vld [vmem:[#allocation2 + $0x110] sm:$0xf0]  ;;  %v1466_v5 = vld [vmem:[#allocation2 + $0x8] sm:$0xf] }
 0x13d   :  { %v540_v62 = vperm.slane %v503_v10, %v1965_v56  ;;  %v1586_v10 = vld [vmem:[#allocation2 + $0xf8] sm:$0xf] }
 0x13e   :  { %v1587_v13 = vor.u32 %v1659_v11, %v1586_v10  ;;  %v1474_v10 = vld [vmem:[#allocation2 + $0x10] sm:$0xf]  ;;  %v1630_v11 = vld [vmem:[#allocation2 + $0x20] sm:$0xf0] }
 0x13f   :  { %v599_v14 = vrot.slane %v540_v62, 4 }
 0x140   :  { %v454_v17 = vpop.f32.mrf.mxu0  ;;  %1043 = vmatpush.bf16.msrb.mxu3 %v1587_v13  ;;  %v1475_v13 = vor.u32 %v1630_v11, %v1474_v10 }
 0x141   :  { %v631_v19 = vmax.f32 %v540_v62, %v599_v14  ;;  %v488_v22 = vadd.f32 %v1962_v45, %v454_v17  ;;  %v1595_v62 = vor.u32 %v1660_v9, %v1594_v8  ;;  %v1574_v14 = vld [vmem:[#allocation2 + $0xd8] sm:$0xf] }
 0x142   :  { %v674_v31 = vld.sshfl [vmem:[#allocation1 + $0x20] sm:$0xff pattern:$0x75316420] }
 0x143   :  { %669 = vst [vmem:[#allocation1 + $0x30] ss:$2 sm:$0xff] %v631_v19  ;;  %v504_v20 = vmax.f32 %v488_v22, 0.0  ;;  %v698_v36 = vpack.c.bf16 %v674_v31, %v674_v31  ;;  %1675 = vmatpush.bf16.msrb.mxu2 %v1595_v62  ;;  %v1575_v22 = vor.u32 %v1655_v15, %v1574_v14  ;;  %1101 = vmatpush.bf16.msra.mxu1 %v1595_v62 }
 0x145   :  { %v544_v24 = vperm.slane %v504_v20, %v1965_v56  ;;  %v762_v42 = vunpack.c.l.b16 %v698_v36  ;;  %v1567_v20 = vor.u32 %v1654_v18, %v1566_v16 }
 0x147   :  { %v600_v26 = vrot.slane %v544_v24, 4  ;;  %1676 = vmatpush.bf16.msrb.mxu2 %v1575_v22  ;;  %1044 = vmatpush.bf16.msrb.mxu3 %v1567_v20 }
 0x148   :  { %v457_v27 = vpop.f32.mrf.mxu0  ;;  %1102 = vmatpush.bf16.msra.mxu1 %v1575_v22 }
 0x149   :  { %v632_v28 = vmax.f32 %v544_v24, %v600_v26  ;;  %v489_v39 = vadd.f32 %v1962_v45, %v457_v27  ;;  %v1650_v26 = vld [vmem:[#allocation2 + $0xc0] sm:$0xf0] }
 0x14b   :  { %671 = vst [vmem:[#allocation1 + $0x31] ss:$2 sm:$0xff] %v632_v28  ;;  %v505_v29 = vmax.f32 %v489_v39, 0.0 }
 0x14d   :  { %v548_v30 = vperm.slane %v505_v29, %v1965_v56 }
 0x14f   :  { %v601_v33 = vrot.slane %v548_v30, 4 }
 0x150   :  { %v459_v34 = vpop.f32.mrf.mxu0 }
 0x151   :  { %v633_v0 = vmax.f32 %v548_v30, %v601_v33  ;;  %v490_v35 = vadd.f32 %v1962_v45, %v459_v34  ;;  %v1547_v30 = vor.u32 %v1649_v23, %v1546_v21  ;;  %v1555_v34 = vor.u32 %v1650_v26, %v1554_v25 }
 0x152   :  { %v675_v37 = vld.sshfl [vmem:[#allocation1 + $0x30] sm:$0xff pattern:$0x75316420] }
 0x153   :  { %676 = vst [vmem:[#allocation1] ss:$2 sm:$0xff] %v633_v0  ;;  %v506_v38 = vmax.f32 %v490_v35, 0.0  ;;  %v699_v40 = vpack.c.bf16 %v675_v37, %v675_v37  ;;  %1045 = vmatpush.bf16.msrb.mxu3 %v1547_v30  ;;  %1677 = vmatpush.bf16.msrb.mxu2 %v1555_v34 }
 0x154   :  { %1103 = vmatpush.bf16.msra.mxu1 %v1555_v34 }
 0x155   :  { %v552_v41 = vperm.slane %v506_v38, %v1965_v56  ;;  %v763_v43 = vunpack.c.l.b16 %v699_v40 }
 0x157   :  { %v602_v1 = vrot.slane %v552_v41, 4  ;;  %v1990_v44 = vpack.c.b16 %v763_v43, %v762_v42  ;;  %v1644_v42 = vld [vmem:[#allocation2 + $0x90] sm:$0xf0]  ;;  %v1534_v43 = vld [vmem:[#allocation2 + $0x88] sm:$0xf] }
 0x158   :  { %v462_v46 = vpop.f32.mrf.mxu0 }
 0x159   :  { %v634_v47 = vmax.f32 %v552_v41, %v602_v1  ;;  %v491_v48 = vadd.f32 %v1962_v45, %v462_v46  ;;  %997 = vmatmul.bf16.gmra.mxu1 %v1990_v44  ;;  %1026 = vmatmul.bf16.gmra.mxu2 %v1990_v44  ;;  %v1526_v41 = vld [vmem:[#allocation2 + $0x80] sm:$0xf] }
 0x15b   :  { %677 = vst [vmem:[#allocation1 + $0x1] ss:$2 sm:$0xff] %v634_v47  ;;  %v507_v49 = vmax.f32 %v491_v48, 0.0  ;;  %v1527_v47 = vor.u32 %v1644_v42, %v1526_v41  ;;  %v1645_v48 = vld [vmem:[#allocation2 + $0x98] sm:$0xf0] }
 0x15d   :  { %v556_v50 = vperm.slane %v507_v49, %v1965_v56  ;;  %v1535_v49 = vor.u32 %v1645_v48, %v1534_v43  ;;  %1046 = vmatpush.bf16.msrb.mxu3 %v1527_v47 }
 0x15f   :  { %v603_v6 = vrot.slane %v556_v50, 4  ;;  %1104 = vmatpush.bf16.msra.mxu1 %v1535_v49  ;;  %1678 = vmatpush.bf16.msrb.mxu2 %v1535_v49 }
 0x160   :  { %v464_v51 = vpop.f32.mrf.mxu0 }
 0x161   :  { %v635_v52 = vmax.f32 %v556_v50, %v603_v6  ;;  %v492_v53 = vadd.f32 %v1962_v45, %v464_v51  ;;  %v1506_v50 = vld [vmem:[#allocation2 + $0x58] sm:$0xf]  ;;  %v1639_v6 = vld [vmem:[#allocation2 + $0x68] sm:$0xf0]  ;;  %v1514_v51 = vld [vmem:[#allocation2 + $0x60] sm:$0xf] }
 0x162   :  { %v684_v17 = vld.sshfl [vmem:[#allocation1] sm:$0xff pattern:$0x75316420] }
 0x163   :  { %678 = vst [vmem:[#allocation1 + $0x10] ss:$2 sm:$0xff] %v635_v52  ;;  %v508_v54 = vmax.f32 %v492_v53, 0.0  ;;  %v700_v39 = vpack.c.bf16 %v684_v17, %v684_v17  ;;  %v1507_v53 = vor.u32 %v1639_v6, %v1506_v50 }
 0x165   :  { %v560_v32 = vperm.slane %v508_v54, %v1965_v56  ;;  %v764_v35 = vunpack.c.l.b16 %v700_v39  ;;  %v1640_v54 = vld [vmem:[#allocation2 + $0x70] sm:$0xf0]  ;;  %1047 = vmatpush.bf16.msrb.mxu3 %v1507_v53 }
 0x166   :  { %v1515_v57 = vor.u32 %v1640_v54, %v1514_v51 }
 0x167   :  { %v604_v60 = vrot.slane %v560_v32, 4 }
 0x168   :  { %v467_v61 = vpop.f32.mrf.mxu0  ;;  %1105 = vmatpush.bf16.msra.mxu1 %v1515_v57  ;;  %1679 = vmatpush.bf16.msrb.mxu2 %v1515_v57 }
 0x169   :  { %v636_v4 = vmax.f32 %v560_v32, %v604_v60  ;;  %v493_v55 = vadd.f32 %v1962_v45, %v467_v61  ;;  %1079 = vmatmul.bf16.vlgmr.msrb.gmra.mxu1 %v1978_v3  ;;  %v1634_v32 = vld [vmem:[#allocation2 + $0x40] sm:$0xf0]  ;;  %v1494_v60 = vld [vmem:[#allocation2 + $0x38] sm:$0xf]  ;;  %v1635_v61 = vld [vmem:[#allocation2 + $0x48] sm:$0xf0] }
 0x16a   :  { %v1487_v2 = vor.u32 %v1634_v32, %v1486_v58 }
 0x16b   :  { %679 = vst [vmem:[#allocation1 + $0x11] ss:$2 sm:$0xff] %v636_v4  ;;  %v509_v7 = vmax.f32 %v493_v55, 0.0  ;;  %v1495_v55 = vor.u32 %v1635_v61, %v1494_v60 }
 0x16c   :  { %1048 = vmatpush.bf16.msrb.mxu3 %v1487_v2 }
 0x16d   :  { %v564_v12 = vperm.slane %v509_v7, %v1965_v56  ;;  %v1629_v7 = vld [vmem:[#allocation2 + $0x18] sm:$0xf0]  ;;  %1106 = vmatpush.bf16.msra.mxu1 %v1495_v55  ;;  %1680 = vmatpush.bf16.msrb.mxu2 %v1495_v55 }
 0x16e   :  { %v1467_v62 = vor.u32 %v1629_v7, %v1466_v5  ;;  %v2057_v5 = vld [vmem:[%s2128_s4] ss:$0 sm:$0xff] }
 0x16f   :  { %v605_v19 = vrot.slane %v564_v12, 4 }
 0x170   :  { %v469_v24 = vpop.f32.mrf.mxu0  ;;  %1049 = vmatpush.bf16.msrb.mxu3 %v1467_v62 }
 0x171   :  { %v637_v27 = vmax.f32 %v564_v12, %v605_v19  ;;  %v494_v28 = vadd.f32 %v1962_v45, %v469_v24  ;;  %1107 = vmatpush.bf16.msra.mxu1 %v1475_v13  ;;  %1681 = vmatpush.bf16.msrb.mxu2 %v1475_v13 }
 0x172   :  { %v685_v29 = vld.sshfl [vmem:[#allocation1 + $0x10] sm:$0xff pattern:$0x75316420] }
 0x173   :  { %680 = vst [vmem:[#allocation1 + $0x20] ss:$2 sm:$0xff] %v637_v27  ;;  %v510_v31 = vmax.f32 %v494_v28, 0.0  ;;  %v701_v33 = vpack.c.bf16 %v685_v29, %v685_v29 }
 0x175   :  { %v568_v0 = vperm.slane %v510_v31, %v1965_v56  ;;  %v765_v36 = vunpack.c.l.b16 %v701_v33 }
 0x177   :  { %v606_v37 = vrot.slane %v568_v0, 4  ;;  %v2003_v38 = vpack.c.b16 %v765_v36, %v764_v35 }
 0x178   :  { %v472_v40 = vpop.f32.mrf.mxu0 }
 0x179   :  { %v638_v1 = vmax.f32 %v568_v0, %v606_v37  ;;  %v495_v46 = vadd.f32 %v1962_v45, %v472_v40  ;;  %1002 = vmatmul.bf16.vlgmr.msra.gmra.mxu3 %v2003_v38  ;;  %1031 = vmatmul.bf16.gmra.mxu2 %v2003_v38 }
 0x17a   :  { %1084 = vmatmul.bf16.gmra.mxu1 %v1990_v44 }
 0x17b   :  { %681 = vst [vmem:[#allocation1 + $0x21] ss:$2 sm:$0xff] %v638_v1  ;;  %v511_v52 = vmax.f32 %v495_v46, 0.0 }
 0x17d   :  { %v572_v59 = vperm.slane %v511_v52, %v1965_v56 }
 0x17f   :  { %v607_v63 = vrot.slane %v572_v59, 4 }
 0x180   :  { %v474_v4 = vpop.f32.mrf.mxu0 }
 0x181   :  { %v639_v8 = vmax.f32 %v572_v59, %v607_v63  ;;  %v496_v9 = vadd.f32 %v1962_v45, %v474_v4 }
 0x182   :  { %v686_v45 = vld.sshfl [vmem:[#allocation1 + $0x20] sm:$0xff pattern:$0x75316420] }
 0x183   :  { %682 = vst [vmem:[#allocation1 + $0x30] ss:$2 sm:$0xff] %v639_v8  ;;  %v512_v12 = vmax.f32 %v496_v9, 0.0  ;;  %v702_v17 = vpack.c.bf16 %v686_v45, %v686_v45 }
 0x185   :  { %v576_v14 = vperm.slane %v512_v12, %v1965_v56  ;;  %v766_v22 = vunpack.c.l.b16 %v702_v17 }
 0x187   :  { %v608_v15 = vrot.slane %v576_v14, 4 }
 0x189   :  { %v640_v16 = vmax.f32 %v576_v14, %v608_v15 }
 0x18a   :  { %1089 = vmatmul.bf16.gmra.mxu1 %v2003_v38 }
 0x18b   :  { %683 = vst [vmem:[#allocation1 + $0x31] ss:$2 sm:$0xff] %v640_v16 }
 0x192   :  { %v687_v18 = vld.sshfl [vmem:[#allocation1 + $0x30] sm:$0xff pattern:$0x75316420] }
 0x193   :  { %v703_v19 = vpack.c.bf16 %v687_v18, %v687_v18 }
 0x195   :  { %v767_v20 = vunpack.c.l.b16 %v703_v19 }
 0x197   :  { %v771_v21 = vpack.c.b16 %v767_v20, %v766_v22 }
 0x199   :  { %1007 = vmatmul.bf16.gmra.mxu3 %v771_v21  ;;  %1036 = vmatmul.bf16.gmra.mxu2 %v771_v21 }
 0x19a   :  { %1094 = vmatmul.bf16.gmra.mxu1 %v771_v21 }
 0x1a9   :  { %1050 = vmatmul.bf16.vlgmr.msrb.gmra.mxu3 %v1978_v3  ;;  %1113 = vmatmul.bf16.vlgmr.msrb.gmra.mxu2 %v1990_v44 }
 0x1aa   :  { %1108 = vmatmul.bf16.vlgmr.msra.gmra.mxu1 %v1978_v3 }
 0x1b6   :  { %v993_v23 = vpop.f32.mrf.mxu1 }
 0x1b9   :  { %1055 = vmatmul.bf16.gmra.mxu3 %v1990_v44  ;;  %1118 = vmatmul.bf16.gmra.mxu2 %v2003_v38 }
 0x1bc   :  { %v1022_v28 = vpop.f32.mrf.mxu2 }
 0x1bd   :  { %v1138_v49 = vrot.slane %v1022_v28, 1 }
 0x1be   :  { %v995_v24 = vpop.f32.mrf.mxu1 }
 0x1c4   :  { %v1024_v29 = vpop.f32.mrf.mxu2 }
 0x1c5   :  { %v1139_v48 = vrot.slane %v1024_v29, 1 }
 0x1c7   :  { %v1140_v6 = vsel %vm190_vm2, %v1138_v49, %v1139_v48 }
 0x1c8   :  { %v1160_v58 = vadd.f32 %v1140_v6, %v993_v23 }
 0x1c9   :  { %1060 = vmatmul.bf16.gmra.mxu3 %v2003_v38  ;;  %1123 = vmatmul.bf16.gmra.mxu2 %v771_v21 }
 0x1d6   :  { %v2019_v25 = vpop.f32.mrf.mxu1 }
 0x1d9   :  { %1065 = vmatmul.bf16.gmra.mxu3 %v771_v21 }
 0x1dc   :  { %v1027_v3 = vpop.f32.mrf.mxu2 }
 0x1dd   :  { %v1141_v32 = vrot.slane %v1027_v3, 1 }
 0x1de   :  { %v2021_v26 = vpop.f32.mrf.mxu1 }
 0x1df   :  { %v1142_v7 = vsel %vm190_vm2, %v1139_v48, %v1141_v32 }
 0x1e0   :  { %v1161_v13 = vadd.f32 %v1142_v7, %v995_v24 }
 0x1e4   :  { %v1029_v31 = vpop.f32.mrf.mxu2 }
 0x1e5   :  { %v1143_v15 = vrot.slane %v1029_v31, 1 }
 0x1e6   :  { %v1080_v27 = vpop.f32.mrf.mxu1 }
 0x1e7   :  { %v1216_v59 = vrot.slane %v1080_v27, 3  ;;  %v1144_v21 = vsel %vm190_vm2, %v1141_v32, %v1143_v15 }
 0x1e8   :  { %v1162_v3 = vadd.f32 %v1144_v21, %v2019_v25 }
 0x1ee   :  { %v1082_v39 = vpop.f32.mrf.mxu1 }
 0x1ef   :  { %v1217_v53 = vrot.slane %v1082_v39, 3  ;;  %v1163_v39 = vadd.f32 %v1143_v15, %v2021_v26 }
 0x1f1   :  { %v1218_v2 = vsel %vm1215_vm10, %v1216_v59, %v1217_v53 }
 0x1f7   :  { %v2023_v30 = vpop.f32.mrf.mxu1 }
 0x1f8   :  { %v1219_v12 = vrot.slane %v2023_v30, 3 }
 0x1fa   :  { %v1220_v18 = vsel %vm1215_vm10, %v1217_v53, %v1219_v12 }
 0x1fc   :  { %v2029_v34 = vpop.f32.mrf.mxu3  ;;  %v2031_v0 = vpop.f32.mrf.mxu2 }
 0x1fd   :  { %v1145_v7 = vrot.slane %v2031_v0, 1 }
 0x1ff   :  { %v2025_v44 = vpop.f32.mrf.mxu1 }
 0x200   :  { %v1221_v29 = vrot.slane %v2025_v44, 3 }
 0x204   :  { %v2035_v36 = vpop.f32.mrf.mxu3  ;;  %v2037_v37 = vpop.f32.mrf.mxu2 }
 0x207   :  { %v2027_v33 = vpop.f32.mrf.mxu1 }
 0x20f   :  { %v2033_v35 = vpop.f32.mrf.mxu1 }
 0x217   :  { %v2039_v38 = vpop.f32.mrf.mxu1 }
 0x21c   :  { %v2041_v40 = vpop.f32.mrf.mxu3  ;;  %v2043_v41 = vpop.f32.mrf.mxu2 }
 0x21d   :  { %v1148_v0 = vrot.slane %v2043_v41, 1 }
 0x21f   :  { %v2045_v42 = vpop.f32.mrf.mxu1 }
 0x224   :  { %v2047_v43 = vpop.f32.mrf.mxu3  ;;  %v2049_v1 = vpop.f32.mrf.mxu2 }
 0x227   :  { %v1109_v46 = vpop.f32.mrf.mxu1 }
 0x228   :  { %v1254_v4 = vrot.slane %v1109_v46, 4 }
 0x22c   :  { %v1051_v47 = vpop.f32.mrf.mxu3  ;;  %v1114_v50 = vpop.f32.mrf.mxu2 }
 0x22d   :  { %v1177_v54 = vrot.slane %v1051_v47, 2  ;;  %v1257_v19 = vrot.slane %v1114_v50, 4 }
 0x22f   :  { %v1111_v51 = vpop.f32.mrf.mxu1 }
 0x230   :  { %v1255_v60 = vrot.slane %v1111_v51, 4 }
 0x232   :  { %v1256_v8 = vsel %vm424_vm4, %v1254_v4, %v1255_v60  ;;  %v1258_v23 = vsel %vm424_vm4, %v1255_v60, %v1257_v19 }
 0x234   :  { %v1053_v52 = vpop.f32.mrf.mxu3  ;;  %v1116_v10 = vpop.f32.mrf.mxu2 }
 0x235   :  { %v1178_v57 = vrot.slane %v1053_v52, 2  ;;  %v1259_v48 = vrot.slane %v1116_v10, 4  ;;  %v1222_v52 = vsel %vm1215_vm10, %v1219_v12, %v1221_v29 }
 0x237   :  { %v1179_v61 = vsel %vm284_vm3, %v1177_v54, %v1178_v57  ;;  %v1260_v54 = vsel %vm424_vm4, %v1257_v19, %v1259_v48 }
 0x238   :  { %v1199_v63 = vadd.f32 %v1179_v61, %v1160_v58 }
 0x23a   :  { %v1238_v55 = vadd.f32 %v1218_v2, %v1199_v63  ;;  %v1146_v63 = vrot.slane %v2037_v37, 1 }
 0x23c   :  { %v1276_v9 = vadd.f32 %v1256_v8, %v1238_v55  ;;  %v1056_v11 = vpop.f32.mrf.mxu3  ;;  %v1119_v47 = vpop.f32.mrf.mxu2  ;;  %v1147_v10 = vsel %vm190_vm2, %v1145_v7, %v1146_v63 }
 0x23d   :  { %v1180_v62 = vrot.slane %v1056_v11, 2  ;;  %v1261_v21 = vrot.slane %v1119_v47, 4 }
 0x23e   :  { %v1288_v14 = vadd.f32 %v2057_v5, %v1276_v9 }
 0x23f   :  { %v1181_v16 = vsel %vm284_vm3, %v1178_v57, %v1180_v62 }
 0x240   :  { %v1296_v45 = vmax.f32 %v1288_v14, 0.0  ;;  %v1200_v17 = vadd.f32 %v1181_v16, %v1161_v13  ;;  %v1224_v13 = vrot.slane %v2033_v35, 3  ;;  %v1164_v16 = vadd.f32 %v1147_v10, %v2029_v34 }
 0x242   :  { %v1307_v22 = vperm.slane %v1296_v45, %v1965_v56  ;;  %v1239_v20 = vadd.f32 %v1220_v18, %v1200_v17  ;;  %v1223_v45 = vrot.slane %v2027_v33, 3  ;;  %v1149_v33 = vsel %vm190_vm2, %v1146_v63, %v1148_v0 }
 0x244   :  { %v1344_v27 = vrot.slane %v1307_v22, 4  ;;  %v1277_v28 = vadd.f32 %v1258_v23, %v1239_v20  ;;  %v1058_v24 = vpop.f32.mrf.mxu3  ;;  %v1121_v55 = vpop.f32.mrf.mxu2  ;;  %v1225_v20 = vsel %vm1215_vm10, %v1223_v45, %v1224_v13 }
 0x245   :  { %v1182_v30 = vrot.slane %v1058_v24, 2  ;;  %v1262_v19 = vrot.slane %v1121_v55, 4  ;;  %v1226_v24 = vrot.slane %v2039_v38, 3 }
 0x246   :  { %v1360_v31 = vmax.f32 %v1307_v22, %v1344_v27  ;;  %v1289_v46 = vadd.f32 %v2057_v5, %v1277_v28 }
 0x247   :  { %v1183_v49 = vsel %vm284_vm3, %v1180_v62, %v1182_v30  ;;  %v1202_v50 = vadd.f32 %v1182_v30, %v1163_v39  ;;  %v1263_v41 = vsel %vm424_vm4, %v1261_v21, %v1262_v19 }
 0x248   :  { %1376 = vst [vmem:[#allocation1] ss:$2 sm:$0xff] %v1360_v31  ;;  %v1297_v6 = vmax.f32 %v1289_v46, 0.0  ;;  %v1201_v51 = vadd.f32 %v1183_v49, %v1162_v3  ;;  %v1150_v3 = vrot.slane %v2049_v1, 1 }
 0x249   :  { %v1241_v53 = vadd.f32 %v1221_v29, %v1202_v50  ;;  %v1165_v29 = vadd.f32 %v1149_v33, %v2035_v36  ;;  %v1227_v50 = vsel %vm1215_vm10, %v1224_v13, %v1226_v24 }
 0x24a   :  { %v1311_v26 = vperm.slane %v1297_v6, %v1965_v56  ;;  %v1240_v44 = vadd.f32 %v1222_v52, %v1201_v51  ;;  %v1151_v36 = vsel %vm190_vm2, %v1148_v0, %v1150_v3 }
 0x24b   :  { %v1279_v25 = vadd.f32 %v1259_v48, %v1241_v53 }
 0x24c   :  { %v1345_v57 = vrot.slane %v1311_v26, 4  ;;  %v1278_v58 = vadd.f32 %v1260_v54, %v1240_v44  ;;  %v1061_v32 = vpop.f32.mrf.mxu3  ;;  %v1124_v34 = vpop.f32.mrf.mxu2  ;;  %v1228_v44 = vrot.slane %v2045_v42, 3  ;;  %v1167_v54 = vadd.f32 %v1150_v3, %v2047_v43 }
 0x24d   :  { %v1291_v59 = vadd.f32 %v2057_v5, %v1279_v25  ;;  %v1184_v15 = vrot.slane %v1061_v32, 2  ;;  %v1264_v31 = vrot.slane %v1124_v34, 4 }
 0x24e   :  { %v1361_v60 = vmax.f32 %v1311_v26, %v1345_v57  ;;  %v1290_v61 = vadd.f32 %v2057_v5, %v1278_v58  ;;  %v1166_v57 = vadd.f32 %v1151_v36, %v2041_v40 }
 0x24f   :  { %v1299_v2 = vmax.f32 %v1291_v59, 0.0  ;;  %v1265_v51 = vsel %vm424_vm4, %v1262_v19, %v1264_v31 }
 0x250   :  { %1378 = vst [vmem:[#allocation1 + $0x1] ss:$2 sm:$0xff] %v1361_v60  ;;  %v1298_v4 = vmax.f32 %v1290_v61, 0.0 }
 0x251   :  { %v1319_v8 = vperm.slane %v1299_v2, %v1965_v56 }
 0x252   :  { %v1315_v9 = vperm.slane %v1298_v4, %v1965_v56  ;;  %v1229_v4 = vsel %vm1215_vm10, %v1226_v24, %v1228_v44 }
 0x253   :  { %v1347_v11 = vrot.slane %v1319_v8, 4 }
 0x254   :  { %v1346_v12 = vrot.slane %v1315_v9, 4  ;;  %v1063_v62 = vpop.f32.mrf.mxu3  ;;  %v1126_v52 = vpop.f32.mrf.mxu2 }
 0x255   :  { %v1363_v14 = vmax.f32 %v1319_v8, %v1347_v11  ;;  %v1185_v37 = vrot.slane %v1063_v62, 2  ;;  %v1266_v59 = vrot.slane %v1126_v52, 4 }
 0x256   :  { %v1362_v17 = vmax.f32 %v1315_v9, %v1346_v12 }
 0x257   :  { %v1383_v18 = vld.sshfl [vmem:[#allocation1] sm:$0xff pattern:$0x75316420]  ;;  %1382 = vst [vmem:[#allocation1 + $0x11] ss:$2 sm:$0xff] %v1363_v14  ;;  %v1186_v22 = vsel %vm284_vm3, %v1184_v15, %v1185_v37  ;;  %v1267_v43 = vsel %vm424_vm4, %v1264_v31, %v1266_v59 }
 0x258   :  { %1399 = vst [vmem:[%s2129_s5] sm:$0xff] %v1383_v18  ;;  %v1203_v35 = vadd.f32 %v1186_v22, %v1164_v16 }
 0x259   :  { %1380 = vst [vmem:[#allocation1 + $0x10] ss:$2 sm:$0xff] %v1362_v17 }
 0x25a   :  { %v1242_v23 = vadd.f32 %v1225_v20, %v1203_v35 }
 0x25c   :  { %v1280_v27 = vadd.f32 %v1263_v41, %v1242_v23  ;;  %v1066_v28 = vpop.f32.mrf.mxu3 }
 0x25d   :  { %v1187_v39 = vrot.slane %v1066_v28, 2 }
 0x25e   :  { %v1292_v30 = vadd.f32 %v2057_v5, %v1280_v27 }
 0x25f   :  { %v1188_v46 = vsel %vm284_vm3, %v1185_v37, %v1187_v39 }
 0x260   :  { %v1384_v47 = vld.sshfl [vmem:[#allocation1 + $0x10] sm:$0xff pattern:$0x75316420]  ;;  %v1300_v48 = vmax.f32 %v1292_v30, 0.0  ;;  %v1204_v49 = vadd.f32 %v1188_v46, %v1165_v29 }
 0x261   :  { %1400 = vst [vmem:[%s2129_s5 + $0x8] sm:$0x1f] %v1384_v47 }
 0x262   :  { %v1323_v38 = vperm.slane %v1300_v48, %v1965_v56  ;;  %v1243_v6 = vadd.f32 %v1227_v50, %v1204_v49 }
 0x264   :  { %v1348_v1 = vrot.slane %v1323_v38, 4  ;;  %v1281_v53 = vadd.f32 %v1265_v51, %v1243_v6  ;;  %v1068_v26 = vpop.f32.mrf.mxu3 }
 0x265   :  { %v1189_v25 = vrot.slane %v1068_v26, 2 }
 0x266   :  { %v1364_v58 = vmax.f32 %v1323_v38, %v1348_v1  ;;  %v1293_v32 = vadd.f32 %v2057_v5, %v1281_v53 }
 0x267   :  { %v1190_v60 = vsel %vm284_vm3, %v1187_v39, %v1189_v25  ;;  %v1206_v61 = vadd.f32 %v1189_v25, %v1167_v54 }
 0x268   :  { %1386 = vst [vmem:[#allocation1 + $0x20] ss:$2 sm:$0xff] %v1364_v58  ;;  %v1301_v63 = vmax.f32 %v1293_v32, 0.0  ;;  %v1205_v2 = vadd.f32 %v1190_v60, %v1166_v57 }
 0x269   :  { %v1245_v55 = vadd.f32 %v1228_v44, %v1206_v61 }
 0x26a   :  { %v1327_v42 = vperm.slane %v1301_v63, %v1965_v56  ;;  %v1244_v7 = vadd.f32 %v1229_v4, %v1205_v2 }
 0x26b   :  { %v1283_v8 = vadd.f32 %v1266_v59, %v1245_v55 }
 0x26c   :  { %v1349_v40 = vrot.slane %v1327_v42, 4  ;;  %v1282_v9 = vadd.f32 %v1267_v43, %v1244_v7 }
 0x26d   :  { %v1295_v10 = vadd.f32 %v2057_v5, %v1283_v8 }
 0x26e   :  { %v1365_v11 = vmax.f32 %v1327_v42, %v1349_v40  ;;  %v1294_v12 = vadd.f32 %v2057_v5, %v1282_v9 }
 0x26f   :  { %v1303_v62 = vmax.f32 %v1295_v10, 0.0 }
 0x270   :  { %1388 = vst [vmem:[#allocation1 + $0x21] ss:$2 sm:$0xff] %v1365_v11  ;;  %v1302_v13 = vmax.f32 %v1294_v12, 0.0 }
 0x271   :  { %v1335_v14 = vperm.slane %v1303_v62, %v1965_v56 }
 0x272   :  { %v1331_v15 = vperm.slane %v1302_v13, %v1965_v56 }
 0x273   :  { %v1351_v37 = vrot.slane %v1335_v14, 4 }
 0x274   :  { %v1350_v16 = vrot.slane %v1331_v15, 4 }
 0x275   :  { %v1367_v45 = vmax.f32 %v1335_v14, %v1351_v37 }
 0x276   :  { %v1366_v0 = vmax.f32 %v1331_v15, %v1350_v16 }
 0x277   :  { %v1393_v17 = vld.sshfl [vmem:[#allocation1 + $0x20] sm:$0xff pattern:$0x75316420]  ;;  %1392 = vst [vmem:[#allocation1 + $0x31] ss:$2 sm:$0xff] %v1367_v45 }
 0x278   :  { %1401 = vst [vmem:[%s2129_s5 + $0x10] sm:$0xff] %v1393_v17 }
 0x279   :  { %1390 = vst [vmem:[#allocation1 + $0x30] ss:$2 sm:$0xff] %v1366_v0 }
 0x280   :  { %v1394_v18 = vld.sshfl [vmem:[#allocation1 + $0x30] sm:$0xff pattern:$0x75316420] }
 0x281   :  { %1402 = vst [vmem:[%s2129_s5 + $0x18] sm:$0x1f] %v1394_v18 }
 0x282   :  { %1407 = vsyncpa [#allocation3], 1 }

</bundles_post_ra>
